<compile_context>
chip_gen: v5e
topology: v5e:2x2
jax: 0.10.0
libtpu: 0.0.40
codegen_flags: <defaults>
</compile_context>

<pallas_src>
import jax
import jax.numpy as jnp
from jax import lax
from jax.experimental import pallas as pl
from jax.experimental.pallas import tpu as pltpu

N_SUBSTEPS = 4  # fixed RK4 substeps per time interval (stand-in for dopri5)


def _decoder_kernel(
    # SMEM
    id0_ref,     # (T,)  int32 : id_time_steps[:, 0]
    ut_ref,      # (T,)  int32 : 1 -> ground truth feeds next xi, 0 -> prediction
    # VMEM (fully resident)
    z0_ref,      # (N, H)
    h0_ref,      # (N, H)
    dt_ref,      # (T, N, 1)  per-row interval lengths (row 0 unused)
    data_ref,    # (T, N, D)
    w_ode_ref,   # (2, H, H)  ode_func MLP weights
    b_ode_ref,   # (2, 1, H)
    wo_ref,      # (H, D)     output_layer weight
    bo_ref,      # (1, D)
    wy_ref,      # (2, H, 2H) GRU gates on y_mean, packed {u|r} and {new_mean|new_std}
    ws_ref,      # (2, H, 2H) GRU gates on y_std
    wx_ref,      # (2, D, 2H) GRU gates on xi
    bg_ref,      # (2, 1, 2H)
    # output
    pred_ref,    # (T, N, D)
):
    T, N, D = pred_ref.shape
    H = z0_ref.shape[-1]
    f32 = jnp.float32

    # ---- hoist weight loads / bias broadcasts (loop-invariant) ------------
    w1, w2 = w_ode_ref[0], w_ode_ref[1]
    b1 = jnp.broadcast_to(b_ode_ref[0], (N, H))
    b2 = jnp.broadcast_to(b_ode_ref[1], (N, H))
    wo = wo_ref[...]
    bo = jnp.broadcast_to(bo_ref[...], (N, D))
    wy01, wy23 = wy_ref[0], wy_ref[1]
    ws01, ws23 = ws_ref[0], ws_ref[1]
    wx01, wx23 = wx_ref[0], wx_ref[1]
    b01 = jnp.broadcast_to(bg_ref[0], (N, 2 * H))
    b23 = jnp.broadcast_to(bg_ref[1], (N, 2 * H))

    def ode_f(y):
        h = jnp.tanh(jnp.dot(y, w1, preferred_element_type=f32) + b1)
        return jnp.dot(h, w2, preferred_element_type=f32) + b2

    def output_layer(sol):
        return jnp.dot(sol, wo, preferred_element_type=f32) + bo

    def gru_update(sol, prev_s, xi):
        # gates {update, reset} fused into one (N, 2H) matmul result per source
        ur = jax.nn.sigmoid(
            jnp.dot(sol, wy01, preferred_element_type=f32)
            + jnp.dot(prev_s, ws01, preferred_element_type=f32)
            + jnp.dot(xi, wx01, preferred_element_type=f32)
            + b01)
        u, r = ur[:, :H], ur[:, H:]
        # gates {new_mean, new_std} fused likewise, on the r-scaled inputs
        nm_ns = (jnp.dot(sol * r, wy23, preferred_element_type=f32)
                 + jnp.dot(prev_s * r, ws23, preferred_element_type=f32)
                 + jnp.dot(xi, wx23, preferred_element_type=f32)
                 + b23)
        new_mean, new_std = nm_ns[:, :H], jnp.abs(nm_ns[:, H:])
        new_y = (1.0 - u) * new_mean + u * sol
        new_s = (1.0 - u) * new_std + u * prev_s
        return new_y, new_s

    def post(t, sol, prev_s, xi):
        out = output_layer(sol)
        pred_ref[t] = out.astype(pred_ref.dtype)
        new_y, new_s = gru_update(sol, prev_s, xi)
        # xi for the next step (exact 0/1 blend; detach is a forward no-op)
        flag = (ut_ref[t] == 1).astype(f32)
        truth = data_ref[id0_ref[t]].astype(f32)            # (N, D)
        new_xi = flag * truth + (1.0 - flag) * out
        return new_y, new_s, new_xi

    # ---- t == 0 : single Euler step, fixed dt = 0.01 -----------------------
    prev_y = z0_ref[...].astype(f32)
    prev_s = h0_ref[...].astype(f32)
    xi = jnp.zeros((N, D), f32)
    sol0 = prev_y + 0.01 * ode_f(prev_y)
    carry0 = post(0, sol0, prev_s, xi)

    # ---- t >= 1 : fixed-step RK4 over [ts[t-1], ts[t]] per row -------------
    def step(t, carry):
        prev_y, prev_s, xi = carry
        h = dt_ref[t] * (1.0 / N_SUBSTEPS)                   # (N, 1)
        y = prev_y
        for _ in range(N_SUBSTEPS):                          # static unroll
            k1 = ode_f(y)
            k2 = ode_f(y + 0.5 * h * k1)
            k3 = ode_f(y + 0.5 * h * k2)
            k4 = ode_f(y + h * k3)
            y = y + (h * (1.0 / 6.0)) * (k1 + 2.0 * k2 + 2.0 * k3 + k4)
        return post(t, y, prev_s, xi)

    lax.fori_loop(1, T, step, carry0)


def diffeq_solver_prediction(params, z0, hidden, data, time_steps, *, point_num):
    """Pallas forward. Returns predictions of shape (T, batch, point_num, D)."""
    T, B = time_steps.shape
    N, H = z0.shape
    D = data.shape[-1]
    assert N == B * point_num and data.shape[1] == N and data.shape[0] >= T

    ts_sorted = jnp.sort(time_steps, axis=0)
    id_ts = jnp.argsort(time_steps, axis=0)
    id0 = id_ts[:, 0].astype(jnp.int32)                                # (T,)
    use_truth = (id0 < (T // 2)).astype(jnp.int32)                     # (T,)
    dt = jnp.concatenate(
        [jnp.zeros((1, B), ts_sorted.dtype), ts_sorted[1:] - ts_sorted[:-1]], axis=0)
    dt_rows = jnp.repeat(dt, point_num, axis=1)[..., None].astype(jnp.float32)  # (T,N,1)

    # Pack GRU gate weights pairwise along the output dim: {0,1} and {2,3}.
    wy, ws, wx, bg = params["wy"], params["ws"], params["wx"], params["bg"]

    def pack(w):
        return jnp.stack([jnp.concatenate([w[0], w[1]], axis=-1),
                          jnp.concatenate([w[2], w[3]], axis=-1)]).astype(jnp.float32)

    wy_p, ws_p, wx_p, bg_p = pack(wy), pack(ws), pack(wx), pack(bg)

    smem = pl.BlockSpec(memory_space=pltpu.MemorySpace.SMEM)
    vmem = pl.BlockSpec(memory_space=pltpu.MemorySpace.VMEM)

    preds = pl.pallas_call(
        _decoder_kernel,
        out_shape=jax.ShapeDtypeStruct((T, N, D), jnp.float32),
        in_specs=[smem, smem] + [vmem] * 12,
        out_specs=vmem,
    )(
        id0, use_truth,
        z0.astype(jnp.float32), hidden.astype(jnp.float32),
        dt_rows, data.astype(jnp.float32),
        params["w_ode"].astype(jnp.float32), params["b_ode"].astype(jnp.float32),
        params["wo"].astype(jnp.float32), params["bo"].astype(jnp.float32),
        wy_p, ws_p, wx_p, bg_p,
    )
    return preds.reshape(T, B, point_num, D)


def reference_forward(params, z0, hidden, data, time_steps, *, point_num,
                      n_substeps=N_SUBSTEPS):
    """Pure-JAX reference with identical math (fixed-step RK4 for odeint)."""
    T, B = time_steps.shape
    N, H = z0.shape
    D = data.shape[-1]
    ts_sorted = jnp.sort(time_steps, axis=0)
    id_ts = jnp.argsort(time_steps, axis=0)

    w1, w2 = params["w_ode"][0], params["w_ode"][1]
    b1, b2 = params["b_ode"][0], params["b_ode"][1]
    wo, bo = params["wo"], params["bo"]
    wy, ws, wx, bg = params["wy"], params["ws"], params["wx"], params["bg"]

    def ode_f(y):
        return jnp.tanh(y @ w1 + b1) @ w2 + b2

    def gru_update(y_mean, y_std, x):
        u = jax.nn.sigmoid(y_mean @ wy[0] + y_std @ ws[0] + x @ wx[0] + bg[0])
        r = jax.nn.sigmoid(y_mean @ wy[1] + y_std @ ws[1] + x @ wx[1] + bg[1])
        nm = (y_mean * r) @ wy[2] + (y_std * r) @ ws[2] + x @ wx[2] + bg[2]
        ns = jnp.abs((y_mean * r) @ wy[3] + (y_std * r) @ ws[3] + x @ wx[3] + bg[3])
        return (1.0 - u) * nm + u * y_mean, (1.0 - u) * ns + u * y_std

    prev_y = z0.astype(jnp.float32)
    prev_s = hidden.astype(jnp.float32)
    xi = jnp.zeros((N, D), jnp.float32)
    preds = []
    for t in range(T):
        if t == 0:
            sol = prev_y + 0.01 * ode_f(prev_y)
        else:
            dt = ts_sorted[t] - ts_sorted[t - 1]                       # (B,)
            h = jnp.repeat(dt, point_num)[:, None] * (1.0 / n_substeps)
            y = prev_y
            for _ in range(n_substeps):
                k1 = ode_f(y)
                k2 = ode_f(y + 0.5 * h * k1)
                k3 = ode_f(y + 0.5 * h * k2)
                k4 = ode_f(y + h * k3)
                y = y + (h * (1.0 / 6.0)) * (k1 + 2.0 * k2 + 2.0 * k3 + k4)
            sol = y
        out = sol @ wo + bo
        prev_y, prev_s = gru_update(sol, prev_s, xi)
        preds.append(out)
        if int(id_ts[t, 0]) < T // 2:
            xi = data[id_ts[t, 0]].astype(jnp.float32)
        else:
            xi = out
    return jnp.stack(preds).reshape(T, B, point_num, D)


if __name__ == "__main__":
    key = jax.random.PRNGKey(0)
    batch, point_num, hidden_dim, output_dim, T = 2, 8, 32, 4, 8
    N = batch * point_num

    keys = jax.random.split(key, 12)
    params = {
        "w_ode": jax.random.normal(keys[0], (2, hidden_dim, hidden_dim), jnp.float32) * 0.15,
        "b_ode": jax.random.normal(keys[1], (2, 1, hidden_dim), jnp.float32) * 0.05,
        "wo":    jax.random.normal(keys[2], (hidden_dim, output_dim), jnp.float32) * 0.2,
        "bo":    jax.random.normal(keys[3], (1, output_dim), jnp.float32) * 0.05,
        "wy":    jax.random.normal(keys[4], (4, hidden_dim, hidden_dim), jnp.float32) * 0.15,
        "ws":    jax.random.normal(keys[5], (4, hidden_dim, hidden_dim), jnp.float32) * 0.15,
        "wx":    jax.random.normal(keys[6], (4, output_dim, hidden_dim), jnp.float32) * 0.3,
        "bg":    jax.random.normal(keys[7], (4, 1, hidden_dim), jnp.float32) * 0.05,
    }
    z0 = jax.random.normal(keys[8], (N, hidden_dim), jnp.float32)
    hidden = jax.random.normal(keys[9], (N, hidden_dim), jnp.float32) * 0.1
    data = jax.random.normal(keys[10], (T, N, output_dim), jnp.float32)
    time_steps = jax.random.uniform(keys[11], (T, batch), jnp.float32,
                                    minval=0.0, maxval=1.0)

    preds = diffeq_solver_prediction(params, z0, hidden, data, time_steps,
                                     point_num=point_num)
    jax.block_until_ready(preds)

    ref = reference_forward(params, z0, hidden, data, time_steps,
                            point_num=point_num)
    assert preds.shape == (T, batch, point_num, output_dim)
    err = float(jnp.max(jnp.abs(preds - ref)))
    assert jnp.allclose(preds, ref, atol=1e-3, rtol=1e-3), f"max abs err {err}"

    print("KERNEL_OK")
</pallas_src>

<mosaic_0001>
module attributes {stable_mosaic.version = 11 : i64} {
  func.func @_decoder_kernel(%arg0: memref<8xi32, #tpu.memory_space<smem>>, %arg1: memref<8xi32, #tpu.memory_space<smem>>, %arg2: memref<16x32xf32, #tpu.memory_space<vmem>>, %arg3: memref<16x32xf32, #tpu.memory_space<vmem>>, %arg4: memref<8x16x1xf32, #tpu.memory_space<vmem>>, %arg5: memref<8x16x4xf32, #tpu.memory_space<vmem>>, %arg6: memref<2x32x32xf32, #tpu.memory_space<vmem>>, %arg7: memref<2x1x32xf32, #tpu.memory_space<vmem>>, %arg8: memref<32x4xf32, #tpu.memory_space<vmem>>, %arg9: memref<1x4xf32, #tpu.memory_space<vmem>>, %arg10: memref<2x32x64xf32, #tpu.memory_space<vmem>>, %arg11: memref<2x32x64xf32, #tpu.memory_space<vmem>>, %arg12: memref<2x4x64xf32, #tpu.memory_space<vmem>>, %arg13: memref<2x1x64xf32, #tpu.memory_space<vmem>>, %arg14: memref<8x16x4xf32, #tpu.memory_space<vmem>>) attributes {dimension_semantics = [], scalar_prefetch = 0 : i64, scratch_operands = 0 : i64, tpu.core_type = #tpu.core_type<tc>} {
    %c0 = arith.constant 0 : index
    %c0_0 = arith.constant 0 : index
    %c0_1 = arith.constant 0 : index
    %0 = vector.load %arg6[%c0, %c0_0, %c0_1] : memref<2x32x32xf32, #tpu.memory_space<vmem>>, vector<1x32x32xf32>
    %1 = vector.shape_cast %0 : vector<1x32x32xf32> to vector<32x32xf32>
    %c1 = arith.constant 1 : index
    %c0_2 = arith.constant 0 : index
    %c0_3 = arith.constant 0 : index
    %2 = vector.load %arg6[%c1, %c0_2, %c0_3] : memref<2x32x32xf32, #tpu.memory_space<vmem>>, vector<1x32x32xf32>
    %3 = vector.shape_cast %2 : vector<1x32x32xf32> to vector<32x32xf32>
    %c0_4 = arith.constant 0 : index
    %c0_5 = arith.constant 0 : index
    %c0_6 = arith.constant 0 : index
    %4 = vector.load %arg7[%c0_4, %c0_5, %c0_6] : memref<2x1x32xf32, #tpu.memory_space<vmem>>, vector<1x1x32xf32>
    %5 = vector.shape_cast %4 : vector<1x1x32xf32> to vector<1x32xf32>
    %6 = vector.shape_cast %5 : vector<1x32xf32> to vector<1x32xf32>
    %7 = vector.broadcast %6 : vector<1x32xf32> to vector<16x32xf32>
    %c1_7 = arith.constant 1 : index
    %c0_8 = arith.constant 0 : index
    %c0_9 = arith.constant 0 : index
    %8 = vector.load %arg7[%c1_7, %c0_8, %c0_9] : memref<2x1x32xf32, #tpu.memory_space<vmem>>, vector<1x1x32xf32>
    %9 = vector.shape_cast %8 : vector<1x1x32xf32> to vector<1x32xf32>
    %10 = vector.shape_cast %9 : vector<1x32xf32> to vector<1x32xf32>
    %11 = vector.broadcast %10 : vector<1x32xf32> to vector<16x32xf32>
    %c0_10 = arith.constant 0 : index
    %c0_11 = arith.constant 0 : index
    %12 = vector.load %arg8[%c0_10, %c0_11] : memref<32x4xf32, #tpu.memory_space<vmem>>, vector<32x4xf32>
    %c0_12 = arith.constant 0 : index
    %c0_13 = arith.constant 0 : index
    %13 = vector.load %arg9[%c0_12, %c0_13] : memref<1x4xf32, #tpu.memory_space<vmem>>, vector<1x4xf32>
    %14 = vector.shape_cast %13 : vector<1x4xf32> to vector<1x4xf32>
    %15 = vector.broadcast %14 : vector<1x4xf32> to vector<16x4xf32>
    %c0_14 = arith.constant 0 : index
    %c0_15 = arith.constant 0 : index
    %c0_16 = arith.constant 0 : index
    %16 = vector.load %arg10[%c0_14, %c0_15, %c0_16] : memref<2x32x64xf32, #tpu.memory_space<vmem>>, vector<1x32x64xf32>
    %17 = vector.shape_cast %16 : vector<1x32x64xf32> to vector<32x64xf32>
    %c1_17 = arith.constant 1 : index
    %c0_18 = arith.constant 0 : index
    %c0_19 = arith.constant 0 : index
    %18 = vector.load %arg10[%c1_17, %c0_18, %c0_19] : memref<2x32x64xf32, #tpu.memory_space<vmem>>, vector<1x32x64xf32>
    %19 = vector.shape_cast %18 : vector<1x32x64xf32> to vector<32x64xf32>
    %c0_20 = arith.constant 0 : index
    %c0_21 = arith.constant 0 : index
    %c0_22 = arith.constant 0 : index
    %20 = vector.load %arg11[%c0_20, %c0_21, %c0_22] : memref<2x32x64xf32, #tpu.memory_space<vmem>>, vector<1x32x64xf32>
    %21 = vector.shape_cast %20 : vector<1x32x64xf32> to vector<32x64xf32>
    %c1_23 = arith.constant 1 : index
    %c0_24 = arith.constant 0 : index
    %c0_25 = arith.constant 0 : index
    %22 = vector.load %arg11[%c1_23, %c0_24, %c0_25] : memref<2x32x64xf32, #tpu.memory_space<vmem>>, vector<1x32x64xf32>
    %23 = vector.shape_cast %22 : vector<1x32x64xf32> to vector<32x64xf32>
    %c0_26 = arith.constant 0 : index
    %c0_27 = arith.constant 0 : index
    %c0_28 = arith.constant 0 : index
    %24 = vector.load %arg12[%c0_26, %c0_27, %c0_28] : memref<2x4x64xf32, #tpu.memory_space<vmem>>, vector<1x4x64xf32>
    %25 = vector.shape_cast %24 : vector<1x4x64xf32> to vector<4x64xf32>
    %c1_29 = arith.constant 1 : index
    %c0_30 = arith.constant 0 : index
    %c0_31 = arith.constant 0 : index
    %26 = vector.load %arg12[%c1_29, %c0_30, %c0_31] : memref<2x4x64xf32, #tpu.memory_space<vmem>>, vector<1x4x64xf32>
    %27 = vector.shape_cast %26 : vector<1x4x64xf32> to vector<4x64xf32>
    %c0_32 = arith.constant 0 : index
    %c0_33 = arith.constant 0 : index
    %c0_34 = arith.constant 0 : index
    %28 = vector.load %arg13[%c0_32, %c0_33, %c0_34] : memref<2x1x64xf32, #tpu.memory_space<vmem>>, vector<1x1x64xf32>
    %29 = vector.shape_cast %28 : vector<1x1x64xf32> to vector<1x64xf32>
    %30 = vector.shape_cast %29 : vector<1x64xf32> to vector<1x64xf32>
    %31 = vector.broadcast %30 : vector<1x64xf32> to vector<16x64xf32>
    %c1_35 = arith.constant 1 : index
    %c0_36 = arith.constant 0 : index
    %c0_37 = arith.constant 0 : index
    %32 = vector.load %arg13[%c1_35, %c0_36, %c0_37] : memref<2x1x64xf32, #tpu.memory_space<vmem>>, vector<1x1x64xf32>
    %33 = vector.shape_cast %32 : vector<1x1x64xf32> to vector<1x64xf32>
    %34 = vector.shape_cast %33 : vector<1x64xf32> to vector<1x64xf32>
    %35 = vector.broadcast %34 : vector<1x64xf32> to vector<16x64xf32>
    %c0_38 = arith.constant 0 : index
    %c0_39 = arith.constant 0 : index
    %36 = vector.load %arg2[%c0_38, %c0_39] : memref<16x32xf32, #tpu.memory_space<vmem>>, vector<16x32xf32>
    %c0_40 = arith.constant 0 : index
    %c0_41 = arith.constant 0 : index
    %37 = vector.load %arg3[%c0_40, %c0_41] : memref<16x32xf32, #tpu.memory_space<vmem>>, vector<16x32xf32>
    %cst = arith.constant 0.000000e+00 : f32
    %38 = vector.broadcast %cst : f32 to vector<16x4xf32>
    %cst_42 = arith.constant dense<0.000000e+00> : vector<16x32xf32>
    %39 = tpu.matmul %36, %1, %cst_42 {dimension_numbers = #tpu.dot_dimension_numbers<[1], [0], [0], [1], [0, 0, 1, 1], [], []>} : vector<16x32xf32>, vector<32x32xf32>, vector<16x32xf32> -> vector<16x32xf32>
    %40 = arith.addf %39, %7 : vector<16x32xf32>
    %41 = math.tanh %40 : vector<16x32xf32>
    %cst_43 = arith.constant dense<0.000000e+00> : vector<16x32xf32>
    %42 = tpu.matmul %41, %3, %cst_43 {dimension_numbers = #tpu.dot_dimension_numbers<[1], [0], [0], [1], [0, 0, 1, 1], [], []>} : vector<16x32xf32>, vector<32x32xf32>, vector<16x32xf32> -> vector<16x32xf32>
    %43 = arith.addf %42, %11 : vector<16x32xf32>
    %cst_44 = arith.constant 0.00999999977 : f32
    %44 = vector.broadcast %cst_44 : f32 to vector<16x32xf32>
    %45 = arith.mulf %44, %43 : vector<16x32xf32>
    %46 = arith.addf %36, %45 : vector<16x32xf32>
    %cst_45 = arith.constant dense<0.000000e+00> : vector<16x4xf32>
    %47 = tpu.matmul %46, %12, %cst_45 {dimension_numbers = #tpu.dot_dimension_numbers<[1], [0], [0], [1], [0, 0, 1, 1], [], []>} : vector<16x32xf32>, vector<32x4xf32>, vector<16x4xf32> -> vector<16x4xf32>
    %48 = arith.addf %47, %15 : vector<16x4xf32>
    %c0_46 = arith.constant 0 : index
    %c0_47 = arith.constant 0 : index
    %c0_48 = arith.constant 0 : index
    %49 = vector.load %arg14[%c0_46, %c0_47, %c0_48] : memref<8x16x4xf32, #tpu.memory_space<vmem>>, vector<1x16x4xf32>
    %50 = vector.shape_cast %49 : vector<1x16x4xf32> to vector<16x4xf32>
    %51 = vector.shape_cast %48 : vector<16x4xf32> to vector<1x16x4xf32>
    tpu.vector_store %arg14[%c0_46, %c0_47, %c0_48], %51 {strides = array<i32>} : memref<8x16x4xf32, #tpu.memory_space<vmem>>, vector<1x16x4xf32>,
    %cst_49 = arith.constant dense<0.000000e+00> : vector<16x64xf32>
    %52 = tpu.matmul %46, %17, %cst_49 {dimension_numbers = #tpu.dot_dimension_numbers<[1], [0], [0], [1], [0, 0, 1, 1], [], []>} : vector<16x32xf32>, vector<32x64xf32>, vector<16x64xf32> -> vector<16x64xf32>
    %cst_50 = arith.constant dense<0.000000e+00> : vector<16x64xf32>
    %53 = tpu.matmul %37, %21, %cst_50 {dimension_numbers = #tpu.dot_dimension_numbers<[1], [0], [0], [1], [0, 0, 1, 1], [], []>} : vector<16x32xf32>, vector<32x64xf32>, vector<16x64xf32> -> vector<16x64xf32>
    %54 = arith.addf %52, %53 : vector<16x64xf32>
    %cst_51 = arith.constant dense<0.000000e+00> : vector<16x64xf32>
    %55 = tpu.matmul %38, %25, %cst_51 {dimension_numbers = #tpu.dot_dimension_numbers<[1], [0], [0], [1], [0, 0, 1, 1], [], []>} : vector<16x4xf32>, vector<4x64xf32>, vector<16x64xf32> -> vector<16x64xf32>
    %56 = arith.addf %54, %55 : vector<16x64xf32>
    %57 = arith.addf %56, %31 : vector<16x64xf32>
    %58 = arith.negf %57 : vector<16x64xf32>
    %59 = math.exp %58 : vector<16x64xf32>
    %cst_52 = arith.constant 1.000000e+00 : f32
    %60 = vector.broadcast %cst_52 : f32 to vector<16x64xf32>
    %61 = arith.addf %60, %59 : vector<16x64xf32>
    %62 = arith.divf %60, %61 : vector<16x64xf32>
    %63 = vector.extract_strided_slice %62 {offsets = [0, 0], sizes = [16, 32], strides = [1, 1]} : vector<16x64xf32> to vector<16x32xf32>
    %64 = vector.extract_strided_slice %62 {offsets = [0, 32], sizes = [16, 32], strides = [1, 1]} : vector<16x64xf32> to vector<16x32xf32>
    %65 = arith.mulf %46, %64 : vector<16x32xf32>
    %cst_53 = arith.constant dense<0.000000e+00> : vector<16x64xf32>
    %66 = tpu.matmul %65, %19, %cst_53 {dimension_numbers = #tpu.dot_dimension_numbers<[1], [0], [0], [1], [0, 0, 1, 1], [], []>} : vector<16x32xf32>, vector<32x64xf32>, vector<16x64xf32> -> vector<16x64xf32>
    %67 = arith.mulf %37, %64 : vector<16x32xf32>
    %cst_54 = arith.constant dense<0.000000e+00> : vector<16x64xf32>
    %68 = tpu.matmul %67, %23, %cst_54 {dimension_numbers = #tpu.dot_dimension_numbers<[1], [0], [0], [1], [0, 0, 1, 1], [], []>} : vector<16x32xf32>, vector<32x64xf32>, vector<16x64xf32> -> vector<16x64xf32>
    %69 = arith.addf %66, %68 : vector<16x64xf32>
    %cst_55 = arith.constant dense<0.000000e+00> : vector<16x64xf32>
    %70 = tpu.matmul %38, %27, %cst_55 {dimension_numbers = #tpu.dot_dimension_numbers<[1], [0], [0], [1], [0, 0, 1, 1], [], []>} : vector<16x4xf32>, vector<4x64xf32>, vector<16x64xf32> -> vector<16x64xf32>
    %71 = arith.addf %69, %70 : vector<16x64xf32>
    %72 = arith.addf %71, %35 : vector<16x64xf32>
    %73 = vector.extract_strided_slice %72 {offsets = [0, 0], sizes = [16, 32], strides = [1, 1]} : vector<16x64xf32> to vector<16x32xf32>
    %74 = vector.extract_strided_slice %72 {offsets = [0, 32], sizes = [16, 32], strides = [1, 1]} : vector<16x64xf32> to vector<16x32xf32>
    %75 = math.absf %74 : vector<16x32xf32>
    %cst_56 = arith.constant 1.000000e+00 : f32
    %76 = vector.broadcast %cst_56 : f32 to vector<16x32xf32>
    %77 = arith.subf %76, %63 : vector<16x32xf32>
    %78 = arith.mulf %77, %73 : vector<16x32xf32>
    %79 = arith.mulf %63, %46 : vector<16x32xf32>
    %80 = arith.addf %78, %79 : vector<16x32xf32>
    %cst_57 = arith.constant 1.000000e+00 : f32
    %81 = vector.broadcast %cst_57 : f32 to vector<16x32xf32>
    %82 = arith.subf %81, %63 : vector<16x32xf32>
    %83 = arith.mulf %82, %75 : vector<16x32xf32>
    %84 = arith.mulf %63, %37 : vector<16x32xf32>
    %85 = arith.addf %83, %84 : vector<16x32xf32>
    %c0_58 = arith.constant 0 : index
    %86 = memref.load %arg1[%c0_58] : memref<8xi32, #tpu.memory_space<smem>>
    %c1_i32 = arith.constant 1 : i32
    %87 = arith.cmpi eq, %86, %c1_i32 : i32
    %88 = arith.extui %87 : i1 to i32
    %89 = arith.sitofp %88 : i32 to f32
    %c0_59 = arith.constant 0 : index
    %90 = memref.load %arg0[%c0_59] : memref<8xi32, #tpu.memory_space<smem>>
    %91 = arith.index_cast %90 : i32 to index
    %c0_60 = arith.constant 0 : index
    %c0_61 = arith.constant 0 : index
    %92 = vector.load %arg5[%91, %c0_60, %c0_61] : memref<8x16x4xf32, #tpu.memory_space<vmem>>, vector<1x16x4xf32>
    %93 = vector.shape_cast %92 : vector<1x16x4xf32> to vector<16x4xf32>
    %94 = vector.broadcast %89 : f32 to vector<16x4xf32>
    %95 = arith.mulf %94, %93 : vector<16x4xf32>
    %cst_62 = arith.constant 1.000000e+00 : f32
    %96 = arith.subf %cst_62, %89 : f32
    %97 = vector.broadcast %96 : f32 to vector<16x4xf32>
    %98 = arith.mulf %97, %48 : vector<16x4xf32>
    %99 = arith.addf %95, %98 : vector<16x4xf32>
    %c1_i32_63 = arith.constant 1 : i32
    %c7_i32 = arith.constant 7 : i32
    %100 = arith.addi %c1_i32_63, %c7_i32 : i32
    %c1_i32_64 = arith.constant 1 : i32
    %101:3 = scf.for %arg15 = %c1_i32_63 to %100 step %c1_i32_64 iter_args(%arg16 = %80, %arg17 = %85, %arg18 = %99) -> (vector<16x32xf32>, vector<16x32xf32>, vector<16x4xf32>)  : i32 {
      %102 = arith.index_cast %arg15 : i32 to index
      %c0_66 = arith.constant 0 : index
      %c0_67 = arith.constant 0 : index
      %103 = vector.load %arg4[%102, %c0_66, %c0_67] : memref<8x16x1xf32, #tpu.memory_space<vmem>>, vector<1x16x1xf32>
      %104 = vector.shape_cast %103 : vector<1x16x1xf32> to vector<16x1xf32>
      %cst_68 = arith.constant 2.500000e-01 : f32
      %105 = vector.broadcast %cst_68 : f32 to vector<16x1xf32>
      %106 = arith.mulf %104, %105 : vector<16x1xf32>
      %cst_69 = arith.constant dense<0.000000e+00> : vector<16x32xf32>
      %107 = tpu.matmul %arg16, %1, %cst_69 {dimension_numbers = #tpu.dot_dimension_numbers<[1], [0], [0], [1], [0, 0, 1, 1], [], []>} : vector<16x32xf32>, vector<32x32xf32>, vector<16x32xf32> -> vector<16x32xf32>
      %108 = arith.addf %107, %7 : vector<16x32xf32>
      %109 = math.tanh %108 : vector<16x32xf32>
      %cst_70 = arith.constant dense<0.000000e+00> : vector<16x32xf32>
      %110 = tpu.matmul %109, %3, %cst_70 {dimension_numbers = #tpu.dot_dimension_numbers<[1], [0], [0], [1], [0, 0, 1, 1], [], []>} : vector<16x32xf32>, vector<32x32xf32>, vector<16x32xf32> -> vector<16x32xf32>
      %111 = arith.addf %110, %11 : vector<16x32xf32>
      %cst_71 = arith.constant 5.000000e-01 : f32
      %112 = vector.broadcast %cst_71 : f32 to vector<16x1xf32>
      %113 = arith.mulf %112, %106 : vector<16x1xf32>
      %114 = vector.broadcast %113 : vector<16x1xf32> to vector<16x32xf32>
      %115 = arith.mulf %114, %111 : vector<16x32xf32>
      %116 = arith.addf %arg16, %115 : vector<16x32xf32>
      %cst_72 = arith.constant dense<0.000000e+00> : vector<16x32xf32>
      %117 = tpu.matmul %116, %1, %cst_72 {dimension_numbers = #tpu.dot_dimension_numbers<[1], [0], [0], [1], [0, 0, 1, 1], [], []>} : vector<16x32xf32>, vector<32x32xf32>, vector<16x32xf32> -> vector<16x32xf32>
      %118 = arith.addf %117, %7 : vector<16x32xf32>
      %119 = math.tanh %118 : vector<16x32xf32>
      %cst_73 = arith.constant dense<0.000000e+00> : vector<16x32xf32>
      %120 = tpu.matmul %119, %3, %cst_73 {dimension_numbers = #tpu.dot_dimension_numbers<[1], [0], [0], [1], [0, 0, 1, 1], [], []>} : vector<16x32xf32>, vector<32x32xf32>, vector<16x32xf32> -> vector<16x32xf32>
      %121 = arith.addf %120, %11 : vector<16x32xf32>
      %cst_74 = arith.constant 5.000000e-01 : f32
      %122 = vector.broadcast %cst_74 : f32 to vector<16x1xf32>
      %123 = arith.mulf %122, %106 : vector<16x1xf32>
      %124 = vector.broadcast %123 : vector<16x1xf32> to vector<16x32xf32>
      %125 = arith.mulf %124, %121 : vector<16x32xf32>
      %126 = arith.addf %arg16, %125 : vector<16x32xf32>
      %cst_75 = arith.constant dense<0.000000e+00> : vector<16x32xf32>
      %127 = tpu.matmul %126, %1, %cst_75 {dimension_numbers = #tpu.dot_dimension_numbers<[1], [0], [0], [1], [0, 0, 1, 1], [], []>} : vector<16x32xf32>, vector<32x32xf32>, vector<16x32xf32> -> vector<16x32xf32>
      %128 = arith.addf %127, %7 : vector<16x32xf32>
      %129 = math.tanh %128 : vector<16x32xf32>
      %cst_76 = arith.constant dense<0.000000e+00> : vector<16x32xf32>
      %130 = tpu.matmul %129, %3, %cst_76 {dimension_numbers = #tpu.dot_dimension_numbers<[1], [0], [0], [1], [0, 0, 1, 1], [], []>} : vector<16x32xf32>, vector<32x32xf32>, vector<16x32xf32> -> vector<16x32xf32>
      %131 = arith.addf %130, %11 : vector<16x32xf32>
      %132 = vector.broadcast %106 : vector<16x1xf32> to vector<16x32xf32>
      %133 = arith.mulf %132, %131 : vector<16x32xf32>
      %134 = arith.addf %arg16, %133 : vector<16x32xf32>
      %cst_77 = arith.constant dense<0.000000e+00> : vector<16x32xf32>
      %135 = tpu.matmul %134, %1, %cst_77 {dimension_numbers = #tpu.dot_dimension_numbers<[1], [0], [0], [1], [0, 0, 1, 1], [], []>} : vector<16x32xf32>, vector<32x32xf32>, vector<16x32xf32> -> vector<16x32xf32>
      %136 = arith.addf %135, %7 : vector<16x32xf32>
      %137 = math.tanh %136 : vector<16x32xf32>
      %cst_78 = arith.constant dense<0.000000e+00> : vector<16x32xf32>
      %138 = tpu.matmul %137, %3, %cst_78 {dimension_numbers = #tpu.dot_dimension_numbers<[1], [0], [0], [1], [0, 0, 1, 1], [], []>} : vector<16x32xf32>, vector<32x32xf32>, vector<16x32xf32> -> vector<16x32xf32>
      %139 = arith.addf %138, %11 : vector<16x32xf32>
      %cst_79 = arith.constant 0.166666672 : f32
      %140 = vector.broadcast %cst_79 : f32 to vector<16x1xf32>
      %141 = arith.mulf %106, %140 : vector<16x1xf32>
      %cst_80 = arith.constant 2.000000e+00 : f32
      %142 = vector.broadcast %cst_80 : f32 to vector<16x32xf32>
      %143 = arith.mulf %142, %121 : vector<16x32xf32>
      %144 = arith.addf %111, %143 : vector<16x32xf32>
      %cst_81 = arith.constant 2.000000e+00 : f32
      %145 = vector.broadcast %cst_81 : f32 to vector<16x32xf32>
      %146 = arith.mulf %145, %131 : vector<16x32xf32>
      %147 = arith.addf %144, %146 : vector<16x32xf32>
      %148 = arith.addf %147, %139 : vector<16x32xf32>
      %149 = vector.broadcast %141 : vector<16x1xf32> to vector<16x32xf32>
      %150 = arith.mulf %149, %148 : vector<16x32xf32>
      %151 = arith.addf %arg16, %150 : vector<16x32xf32>
      %cst_82 = arith.constant dense<0.000000e+00> : vector<16x32xf32>
      %152 = tpu.matmul %151, %1, %cst_82 {dimension_numbers = #tpu.dot_dimension_numbers<[1], [0], [0], [1], [0, 0, 1, 1], [], []>} : vector<16x32xf32>, vector<32x32xf32>, vector<16x32xf32> -> vector<16x32xf32>
      %153 = arith.addf %152, %7 : vector<16x32xf32>
      %154 = math.tanh %153 : vector<16x32xf32>
      %cst_83 = arith.constant dense<0.000000e+00> : vector<16x32xf32>
      %155 = tpu.matmul %154, %3, %cst_83 {dimension_numbers = #tpu.dot_dimension_numbers<[1], [0], [0], [1], [0, 0, 1, 1], [], []>} : vector<16x32xf32>, vector<32x32xf32>, vector<16x32xf32> -> vector<16x32xf32>
      %156 = arith.addf %155, %11 : vector<16x32xf32>
      %cst_84 = arith.constant 5.000000e-01 : f32
      %157 = vector.broadcast %cst_84 : f32 to vector<16x1xf32>
      %158 = arith.mulf %157, %106 : vector<16x1xf32>
      %159 = vector.broadcast %158 : vector<16x1xf32> to vector<16x32xf32>
      %160 = arith.mulf %159, %156 : vector<16x32xf32>
      %161 = arith.addf %151, %160 : vector<16x32xf32>
      %cst_85 = arith.constant dense<0.000000e+00> : vector<16x32xf32>
      %162 = tpu.matmul %161, %1, %cst_85 {dimension_numbers = #tpu.dot_dimension_numbers<[1], [0], [0], [1], [0, 0, 1, 1], [], []>} : vector<16x32xf32>, vector<32x32xf32>, vector<16x32xf32> -> vector<16x32xf32>
      %163 = arith.addf %162, %7 : vector<16x32xf32>
      %164 = math.tanh %163 : vector<16x32xf32>
      %cst_86 = arith.constant dense<0.000000e+00> : vector<16x32xf32>
      %165 = tpu.matmul %164, %3, %cst_86 {dimension_numbers = #tpu.dot_dimension_numbers<[1], [0], [0], [1], [0, 0, 1, 1], [], []>} : vector<16x32xf32>, vector<32x32xf32>, vector<16x32xf32> -> vector<16x32xf32>
      %166 = arith.addf %165, %11 : vector<16x32xf32>
      %cst_87 = arith.constant 5.000000e-01 : f32
      %167 = vector.broadcast %cst_87 : f32 to vector<16x1xf32>
      %168 = arith.mulf %167, %106 : vector<16x1xf32>
      %169 = vector.broadcast %168 : vector<16x1xf32> to vector<16x32xf32>
      %170 = arith.mulf %169, %166 : vector<16x32xf32>
      %171 = arith.addf %151, %170 : vector<16x32xf32>
      %cst_88 = arith.constant dense<0.000000e+00> : vector<16x32xf32>
      %172 = tpu.matmul %171, %1, %cst_88 {dimension_numbers = #tpu.dot_dimension_numbers<[1], [0], [0], [1], [0, 0, 1, 1], [], []>} : vector<16x32xf32>, vector<32x32xf32>, vector<16x32xf32> -> vector<16x32xf32>
      %173 = arith.addf %172, %7 : vector<16x32xf32>
      %174 = math.tanh %173 : vector<16x32xf32>
      %cst_89 = arith.constant dense<0.000000e+00> : vector<16x32xf32>
      %175 = tpu.matmul %174, %3, %cst_89 {dimension_numbers = #tpu.dot_dimension_numbers<[1], [0], [0], [1], [0, 0, 1, 1], [], []>} : vector<16x32xf32>, vector<32x32xf32>, vector<16x32xf32> -> vector<16x32xf32>
      %176 = arith.addf %175, %11 : vector<16x32xf32>
      %177 = vector.broadcast %106 : vector<16x1xf32> to vector<16x32xf32>
      %178 = arith.mulf %177, %176 : vector<16x32xf32>
      %179 = arith.addf %151, %178 : vector<16x32xf32>
      %cst_90 = arith.constant dense<0.000000e+00> : vector<16x32xf32>
      %180 = tpu.matmul %179, %1, %cst_90 {dimension_numbers = #tpu.dot_dimension_numbers<[1], [0], [0], [1], [0, 0, 1, 1], [], []>} : vector<16x32xf32>, vector<32x32xf32>, vector<16x32xf32> -> vector<16x32xf32>
      %181 = arith.addf %180, %7 : vector<16x32xf32>
      %182 = math.tanh %181 : vector<16x32xf32>
      %cst_91 = arith.constant dense<0.000000e+00> : vector<16x32xf32>
      %183 = tpu.matmul %182, %3, %cst_91 {dimension_numbers = #tpu.dot_dimension_numbers<[1], [0], [0], [1], [0, 0, 1, 1], [], []>} : vector<16x32xf32>, vector<32x32xf32>, vector<16x32xf32> -> vector<16x32xf32>
      %184 = arith.addf %183, %11 : vector<16x32xf32>
      %cst_92 = arith.constant 0.166666672 : f32
      %185 = vector.broadcast %cst_92 : f32 to vector<16x1xf32>
      %186 = arith.mulf %106, %185 : vector<16x1xf32>
      %cst_93 = arith.constant 2.000000e+00 : f32
      %187 = vector.broadcast %cst_93 : f32 to vector<16x32xf32>
      %188 = arith.mulf %187, %166 : vector<16x32xf32>
      %189 = arith.addf %156, %188 : vector<16x32xf32>
      %cst_94 = arith.constant 2.000000e+00 : f32
      %190 = vector.broadcast %cst_94 : f32 to vector<16x32xf32>
      %191 = arith.mulf %190, %176 : vector<16x32xf32>
      %192 = arith.addf %189, %191 : vector<16x32xf32>
      %193 = arith.addf %192, %184 : vector<16x32xf32>
      %194 = vector.broadcast %186 : vector<16x1xf32> to vector<16x32xf32>
      %195 = arith.mulf %194, %193 : vector<16x32xf32>
      %196 = arith.addf %151, %195 : vector<16x32xf32>
      %cst_95 = arith.constant dense<0.000000e+00> : vector<16x32xf32>
      %197 = tpu.matmul %196, %1, %cst_95 {dimension_numbers = #tpu.dot_dimension_numbers<[1], [0], [0], [1], [0, 0, 1, 1], [], []>} : vector<16x32xf32>, vector<32x32xf32>, vector<16x32xf32> -> vector<16x32xf32>
      %198 = arith.addf %197, %7 : vector<16x32xf32>
      %199 = math.tanh %198 : vector<16x32xf32>
      %cst_96 = arith.constant dense<0.000000e+00> : vector<16x32xf32>
      %200 = tpu.matmul %199, %3, %cst_96 {dimension_numbers = #tpu.dot_dimension_numbers<[1], [0], [0], [1], [0, 0, 1, 1], [], []>} : vector<16x32xf32>, vector<32x32xf32>, vector<16x32xf32> -> vector<16x32xf32>
      %201 = arith.addf %200, %11 : vector<16x32xf32>
      %cst_97 = arith.constant 5.000000e-01 : f32
      %202 = vector.broadcast %cst_97 : f32 to vector<16x1xf32>
      %203 = arith.mulf %202, %106 : vector<16x1xf32>
      %204 = vector.broadcast %203 : vector<16x1xf32> to vector<16x32xf32>
      %205 = arith.mulf %204, %201 : vector<16x32xf32>
      %206 = arith.addf %196, %205 : vector<16x32xf32>
      %cst_98 = arith.constant dense<0.000000e+00> : vector<16x32xf32>
      %207 = tpu.matmul %206, %1, %cst_98 {dimension_numbers = #tpu.dot_dimension_numbers<[1], [0], [0], [1], [0, 0, 1, 1], [], []>} : vector<16x32xf32>, vector<32x32xf32>, vector<16x32xf32> -> vector<16x32xf32>
      %208 = arith.addf %207, %7 : vector<16x32xf32>
      %209 = math.tanh %208 : vector<16x32xf32>
      %cst_99 = arith.constant dense<0.000000e+00> : vector<16x32xf32>
      %210 = tpu.matmul %209, %3, %cst_99 {dimension_numbers = #tpu.dot_dimension_numbers<[1], [0], [0], [1], [0, 0, 1, 1], [], []>} : vector<16x32xf32>, vector<32x32xf32>, vector<16x32xf32> -> vector<16x32xf32>
      %211 = arith.addf %210, %11 : vector<16x32xf32>
      %cst_100 = arith.constant 5.000000e-01 : f32
      %212 = vector.broadcast %cst_100 : f32 to vector<16x1xf32>
      %213 = arith.mulf %212, %106 : vector<16x1xf32>
      %214 = vector.broadcast %213 : vector<16x1xf32> to vector<16x32xf32>
      %215 = arith.mulf %214, %211 : vector<16x32xf32>
      %216 = arith.addf %196, %215 : vector<16x32xf32>
      %cst_101 = arith.constant dense<0.000000e+00> : vector<16x32xf32>
      %217 = tpu.matmul %216, %1, %cst_101 {dimension_numbers = #tpu.dot_dimension_numbers<[1], [0], [0], [1], [0, 0, 1, 1], [], []>} : vector<16x32xf32>, vector<32x32xf32>, vector<16x32xf32> -> vector<16x32xf32>
      %218 = arith.addf %217, %7 : vector<16x32xf32>
      %219 = math.tanh %218 : vector<16x32xf32>
      %cst_102 = arith.constant dense<0.000000e+00> : vector<16x32xf32>
      %220 = tpu.matmul %219, %3, %cst_102 {dimension_numbers = #tpu.dot_dimension_numbers<[1], [0], [0], [1], [0, 0, 1, 1], [], []>} : vector<16x32xf32>, vector<32x32xf32>, vector<16x32xf32> -> vector<16x32xf32>
      %221 = arith.addf %220, %11 : vector<16x32xf32>
      %222 = vector.broadcast %106 : vector<16x1xf32> to vector<16x32xf32>
      %223 = arith.mulf %222, %221 : vector<16x32xf32>
      %224 = arith.addf %196, %223 : vector<16x32xf32>
      %cst_103 = arith.constant dense<0.000000e+00> : vector<16x32xf32>
      %225 = tpu.matmul %224, %1, %cst_103 {dimension_numbers = #tpu.dot_dimension_numbers<[1], [0], [0], [1], [0, 0, 1, 1], [], []>} : vector<16x32xf32>, vector<32x32xf32>, vector<16x32xf32> -> vector<16x32xf32>
      %226 = arith.addf %225, %7 : vector<16x32xf32>
      %227 = math.tanh %226 : vector<16x32xf32>
      %cst_104 = arith.constant dense<0.000000e+00> : vector<16x32xf32>
      %228 = tpu.matmul %227, %3, %cst_104 {dimension_numbers = #tpu.dot_dimension_numbers<[1], [0], [0], [1], [0, 0, 1, 1], [], []>} : vector<16x32xf32>, vector<32x32xf32>, vector<16x32xf32> -> vector<16x32xf32>
      %229 = arith.addf %228, %11 : vector<16x32xf32>
      %cst_105 = arith.constant 0.166666672 : f32
      %230 = vector.broadcast %cst_105 : f32 to vector<16x1xf32>
      %231 = arith.mulf %106, %230 : vector<16x1xf32>
      %cst_106 = arith.constant 2.000000e+00 : f32
      %232 = vector.broadcast %cst_106 : f32 to vector<16x32xf32>
      %233 = arith.mulf %232, %211 : vector<16x32xf32>
      %234 = arith.addf %201, %233 : vector<16x32xf32>
      %cst_107 = arith.constant 2.000000e+00 : f32
      %235 = vector.broadcast %cst_107 : f32 to vector<16x32xf32>
      %236 = arith.mulf %235, %221 : vector<16x32xf32>
      %237 = arith.addf %234, %236 : vector<16x32xf32>
      %238 = arith.addf %237, %229 : vector<16x32xf32>
      %239 = vector.broadcast %231 : vector<16x1xf32> to vector<16x32xf32>
      %240 = arith.mulf %239, %238 : vector<16x32xf32>
      %241 = arith.addf %196, %240 : vector<16x32xf32>
      %cst_108 = arith.constant dense<0.000000e+00> : vector<16x32xf32>
      %242 = tpu.matmul %241, %1, %cst_108 {dimension_numbers = #tpu.dot_dimension_numbers<[1], [0], [0], [1], [0, 0, 1, 1], [], []>} : vector<16x32xf32>, vector<32x32xf32>, vector<16x32xf32> -> vector<16x32xf32>
      %243 = arith.addf %242, %7 : vector<16x32xf32>
      %244 = math.tanh %243 : vector<16x32xf32>
      %cst_109 = arith.constant dense<0.000000e+00> : vector<16x32xf32>
      %245 = tpu.matmul %244, %3, %cst_109 {dimension_numbers = #tpu.dot_dimension_numbers<[1], [0], [0], [1], [0, 0, 1, 1], [], []>} : vector<16x32xf32>, vector<32x32xf32>, vector<16x32xf32> -> vector<16x32xf32>
      %246 = arith.addf %245, %11 : vector<16x32xf32>
      %cst_110 = arith.constant 5.000000e-01 : f32
      %247 = vector.broadcast %cst_110 : f32 to vector<16x1xf32>
      %248 = arith.mulf %247, %106 : vector<16x1xf32>
      %249 = vector.broadcast %248 : vector<16x1xf32> to vector<16x32xf32>
      %250 = arith.mulf %249, %246 : vector<16x32xf32>
      %251 = arith.addf %241, %250 : vector<16x32xf32>
      %cst_111 = arith.constant dense<0.000000e+00> : vector<16x32xf32>
      %252 = tpu.matmul %251, %1, %cst_111 {dimension_numbers = #tpu.dot_dimension_numbers<[1], [0], [0], [1], [0, 0, 1, 1], [], []>} : vector<16x32xf32>, vector<32x32xf32>, vector<16x32xf32> -> vector<16x32xf32>
      %253 = arith.addf %252, %7 : vector<16x32xf32>
      %254 = math.tanh %253 : vector<16x32xf32>
      %cst_112 = arith.constant dense<0.000000e+00> : vector<16x32xf32>
      %255 = tpu.matmul %254, %3, %cst_112 {dimension_numbers = #tpu.dot_dimension_numbers<[1], [0], [0], [1], [0, 0, 1, 1], [], []>} : vector<16x32xf32>, vector<32x32xf32>, vector<16x32xf32> -> vector<16x32xf32>
      %256 = arith.addf %255, %11 : vector<16x32xf32>
      %cst_113 = arith.constant 5.000000e-01 : f32
      %257 = vector.broadcast %cst_113 : f32 to vector<16x1xf32>
      %258 = arith.mulf %257, %106 : vector<16x1xf32>
      %259 = vector.broadcast %258 : vector<16x1xf32> to vector<16x32xf32>
      %260 = arith.mulf %259, %256 : vector<16x32xf32>
      %261 = arith.addf %241, %260 : vector<16x32xf32>
      %cst_114 = arith.constant dense<0.000000e+00> : vector<16x32xf32>
      %262 = tpu.matmul %261, %1, %cst_114 {dimension_numbers = #tpu.dot_dimension_numbers<[1], [0], [0], [1], [0, 0, 1, 1], [], []>} : vector<16x32xf32>, vector<32x32xf32>, vector<16x32xf32> -> vector<16x32xf32>
      %263 = arith.addf %262, %7 : vector<16x32xf32>
      %264 = math.tanh %263 : vector<16x32xf32>
      %cst_115 = arith.constant dense<0.000000e+00> : vector<16x32xf32>
      %265 = tpu.matmul %264, %3, %cst_115 {dimension_numbers = #tpu.dot_dimension_numbers<[1], [0], [0], [1], [0, 0, 1, 1], [], []>} : vector<16x32xf32>, vector<32x32xf32>, vector<16x32xf32> -> vector<16x32xf32>
      %266 = arith.addf %265, %11 : vector<16x32xf32>
      %267 = vector.broadcast %106 : vector<16x1xf32> to vector<16x32xf32>
      %268 = arith.mulf %267, %266 : vector<16x32xf32>
      %269 = arith.addf %241, %268 : vector<16x32xf32>
      %cst_116 = arith.constant dense<0.000000e+00> : vector<16x32xf32>
      %270 = tpu.matmul %269, %1, %cst_116 {dimension_numbers = #tpu.dot_dimension_numbers<[1], [0], [0], [1], [0, 0, 1, 1], [], []>} : vector<16x32xf32>, vector<32x32xf32>, vector<16x32xf32> -> vector<16x32xf32>
      %271 = arith.addf %270, %7 : vector<16x32xf32>
      %272 = math.tanh %271 : vector<16x32xf32>
      %cst_117 = arith.constant dense<0.000000e+00> : vector<16x32xf32>
      %273 = tpu.matmul %272, %3, %cst_117 {dimension_numbers = #tpu.dot_dimension_numbers<[1], [0], [0], [1], [0, 0, 1, 1], [], []>} : vector<16x32xf32>, vector<32x32xf32>, vector<16x32xf32> -> vector<16x32xf32>
      %274 = arith.addf %273, %11 : vector<16x32xf32>
      %cst_118 = arith.constant 0.166666672 : f32
      %275 = vector.broadcast %cst_118 : f32 to vector<16x1xf32>
      %276 = arith.mulf %106, %275 : vector<16x1xf32>
      %cst_119 = arith.constant 2.000000e+00 : f32
      %277 = vector.broadcast %cst_119 : f32 to vector<16x32xf32>
      %278 = arith.mulf %277, %256 : vector<16x32xf32>
      %279 = arith.addf %246, %278 : vector<16x32xf32>
      %cst_120 = arith.constant 2.000000e+00 : f32
      %280 = vector.broadcast %cst_120 : f32 to vector<16x32xf32>
      %281 = arith.mulf %280, %266 : vector<16x32xf32>
      %282 = arith.addf %279, %281 : vector<16x32xf32>
      %283 = arith.addf %282, %274 : vector<16x32xf32>
      %284 = vector.broadcast %276 : vector<16x1xf32> to vector<16x32xf32>
      %285 = arith.mulf %284, %283 : vector<16x32xf32>
      %286 = arith.addf %241, %285 : vector<16x32xf32>
      %cst_121 = arith.constant dense<0.000000e+00> : vector<16x4xf32>
      %287 = tpu.matmul %286, %12, %cst_121 {dimension_numbers = #tpu.dot_dimension_numbers<[1], [0], [0], [1], [0, 0, 1, 1], [], []>} : vector<16x32xf32>, vector<32x4xf32>, vector<16x4xf32> -> vector<16x4xf32>
      %288 = arith.addf %287, %15 : vector<16x4xf32>
      %289 = arith.index_cast %arg15 : i32 to index
      %c0_122 = arith.constant 0 : index
      %c0_123 = arith.constant 0 : index
      %290 = vector.load %arg14[%289, %c0_122, %c0_123] : memref<8x16x4xf32, #tpu.memory_space<vmem>>, vector<1x16x4xf32>
      %291 = vector.shape_cast %290 : vector<1x16x4xf32> to vector<16x4xf32>
      %292 = vector.shape_cast %288 : vector<16x4xf32> to vector<1x16x4xf32>
      tpu.vector_store %arg14[%289, %c0_122, %c0_123], %292 {strides = array<i32>} : memref<8x16x4xf32, #tpu.memory_space<vmem>>, vector<1x16x4xf32>,
      %cst_124 = arith.constant dense<0.000000e+00> : vector<16x64xf32>
      %293 = tpu.matmul %286, %17, %cst_124 {dimension_numbers = #tpu.dot_dimension_numbers<[1], [0], [0], [1], [0, 0, 1, 1], [], []>} : vector<16x32xf32>, vector<32x64xf32>, vector<16x64xf32> -> vector<16x64xf32>
      %cst_125 = arith.constant dense<0.000000e+00> : vector<16x64xf32>
      %294 = tpu.matmul %arg17, %21, %cst_125 {dimension_numbers = #tpu.dot_dimension_numbers<[1], [0], [0], [1], [0, 0, 1, 1], [], []>} : vector<16x32xf32>, vector<32x64xf32>, vector<16x64xf32> -> vector<16x64xf32>
      %295 = arith.addf %293, %294 : vector<16x64xf32>
      %cst_126 = arith.constant dense<0.000000e+00> : vector<16x64xf32>
      %296 = tpu.matmul %arg18, %25, %cst_126 {dimension_numbers = #tpu.dot_dimension_numbers<[1], [0], [0], [1], [0, 0, 1, 1], [], []>} : vector<16x4xf32>, vector<4x64xf32>, vector<16x64xf32> -> vector<16x64xf32>
      %297 = arith.addf %295, %296 : vector<16x64xf32>
      %298 = arith.addf %297, %31 : vector<16x64xf32>
      %299 = arith.negf %298 : vector<16x64xf32>
      %300 = math.exp %299 : vector<16x64xf32>
      %cst_127 = arith.constant 1.000000e+00 : f32
      %301 = vector.broadcast %cst_127 : f32 to vector<16x64xf32>
      %302 = arith.addf %301, %300 : vector<16x64xf32>
      %303 = arith.divf %301, %302 : vector<16x64xf32>
      %304 = vector.extract_strided_slice %303 {offsets = [0, 0], sizes = [16, 32], strides = [1, 1]} : vector<16x64xf32> to vector<16x32xf32>
      %305 = vector.extract_strided_slice %303 {offsets = [0, 32], sizes = [16, 32], strides = [1, 1]} : vector<16x64xf32> to vector<16x32xf32>
      %306 = arith.mulf %286, %305 : vector<16x32xf32>
      %cst_128 = arith.constant dense<0.000000e+00> : vector<16x64xf32>
      %307 = tpu.matmul %306, %19, %cst_128 {dimension_numbers = #tpu.dot_dimension_numbers<[1], [0], [0], [1], [0, 0, 1, 1], [], []>} : vector<16x32xf32>, vector<32x64xf32>, vector<16x64xf32> -> vector<16x64xf32>
      %308 = arith.mulf %arg17, %305 : vector<16x32xf32>
      %cst_129 = arith.constant dense<0.000000e+00> : vector<16x64xf32>
      %309 = tpu.matmul %308, %23, %cst_129 {dimension_numbers = #tpu.dot_dimension_numbers<[1], [0], [0], [1], [0, 0, 1, 1], [], []>} : vector<16x32xf32>, vector<32x64xf32>, vector<16x64xf32> -> vector<16x64xf32>
      %310 = arith.addf %307, %309 : vector<16x64xf32>
      %cst_130 = arith.constant dense<0.000000e+00> : vector<16x64xf32>
      %311 = tpu.matmul %arg18, %27, %cst_130 {dimension_numbers = #tpu.dot_dimension_numbers<[1], [0], [0], [1], [0, 0, 1, 1], [], []>} : vector<16x4xf32>, vector<4x64xf32>, vector<16x64xf32> -> vector<16x64xf32>
      %312 = arith.addf %310, %311 : vector<16x64xf32>
      %313 = arith.addf %312, %35 : vector<16x64xf32>
      %314 = vector.extract_strided_slice %313 {offsets = [0, 0], sizes = [16, 32], strides = [1, 1]} : vector<16x64xf32> to vector<16x32xf32>
      %315 = vector.extract_strided_slice %313 {offsets = [0, 32], sizes = [16, 32], strides = [1, 1]} : vector<16x64xf32> to vector<16x32xf32>
      %316 = math.absf %315 : vector<16x32xf32>
      %cst_131 = arith.constant 1.000000e+00 : f32
      %317 = vector.broadcast %cst_131 : f32 to vector<16x32xf32>
      %318 = arith.subf %317, %304 : vector<16x32xf32>
      %319 = arith.mulf %318, %314 : vector<16x32xf32>
      %320 = arith.mulf %304, %286 : vector<16x32xf32>
      %321 = arith.addf %319, %320 : vector<16x32xf32>
      %cst_132 = arith.constant 1.000000e+00 : f32
      %322 = vector.broadcast %cst_132 : f32 to vector<16x32xf32>
      %323 = arith.subf %322, %304 : vector<16x32xf32>
      %324 = arith.mulf %323, %316 : vector<16x32xf32>
      %325 = arith.mulf %304, %arg17 : vector<16x32xf32>
      %326 = arith.addf %324, %325 : vector<16x32xf32>
      %327 = arith.index_cast %arg15 : i32 to index
      %328 = memref.load %arg1[%327] : memref<8xi32, #tpu.memory_space<smem>>
      %c1_i32_133 = arith.constant 1 : i32
      %329 = arith.cmpi eq, %328, %c1_i32_133 : i32
      %330 = arith.extui %329 : i1 to i32
      %331 = arith.sitofp %330 : i32 to f32
      %332 = arith.index_cast %arg15 : i32 to index
      %333 = memref.load %arg0[%332] : memref<8xi32, #tpu.memory_space<smem>>
      %334 = arith.index_cast %333 : i32 to index
      %c0_134 = arith.constant 0 : index
      %c0_135 = arith.constant 0 : index
      %335 = vector.load %arg5[%334, %c0_134, %c0_135] : memref<8x16x4xf32, #tpu.memory_space<vmem>>, vector<1x16x4xf32>
      %336 = vector.shape_cast %335 : vector<1x16x4xf32> to vector<16x4xf32>
      %337 = vector.broadcast %331 : f32 to vector<16x4xf32>
      %338 = arith.mulf %337, %336 : vector<16x4xf32>
      %cst_136 = arith.constant 1.000000e+00 : f32
      %339 = arith.subf %cst_136, %331 : f32
      %340 = vector.broadcast %339 : f32 to vector<16x4xf32>
      %341 = arith.mulf %340, %288 : vector<16x4xf32>
      %342 = arith.addf %338, %341 : vector<16x4xf32>
      scf.yield %321, %326, %342 : vector<16x32xf32>, vector<16x32xf32>, vector<16x4xf32>
    }
    %c7_i32_65 = arith.constant 7 : i32
    return
  }
}

</mosaic_0001>

<bundles_post_ra>
// kernel: tpu_custom_call.1
= control target key start
LH: loop header
LB: loop body
LE: loop exit
PB: predicated region body
PF: predicated region fallthrough
CT: control target
= control target key end

     0   :  { %19 = vsyncpa [#allocation3], 0  ;;  %s3220_s0 = inlined_call_operand.vmem [shape: s32[8], index: 0, kind: input, shape index: {}]   ;;  %s3221_s1 = inlined_call_operand.vmem [shape: s32[8], index: 1, kind: input, shape index: {}]   ;;  %s3222_s2 = inlined_call_operand.vmem [shape: f32[16,32], index: 2, kind: input, shape index: {}]   ;;  %s3223_s3 = inlined_call_operand.vmem [shape: f32[16,32], index: 3, kind: input, shape index: {}]   ;;  %s3224_s4 = inlined_call_operand.vmem [shape: f32[8,16,1], index: 4, kind: input, shape index: {}]   ;;  %s3225_s5 = inlined_call_operand.vmem [shape: f32[8,16,4], index: 5, kind: input, shape index: {}]   ;;  %s3226_s6 = inlined_call_operand.vmem [shape: f32[2,32,32], index: 6, kind: input, shape index: {}]   ;;  %s3227_s7 = inlined_call_operand.vmem [shape: f32[2,1,32], index: 7, kind: input, shape index: {}]   ;;  %s3228_s8 = inlined_call_operand.vmem [shape: f32[32,4], index: 8, kind: input, shape index: {}]   ;;  %s3229_s9 = inlined_call_operand.vmem [shape: f32[1,4], index: 9, kind: input, shape index: {}]   ;;  %s3230_s10 = inlined_call_operand.vmem [shape: f32[2,32,64], index: 10, kind: input, shape index: {}]   ;;  %s3231_s11 = inlined_call_operand.vmem [shape: f32[2,32,64], index: 11, kind: input, shape index: {}]   ;;  %s3232_s12 = inlined_call_operand.vmem [shape: f32[2,4,64], index: 12, kind: input, shape index: {}]   ;;  %s3233_s13 = inlined_call_operand.vmem [shape: f32[2,1,64], index: 13, kind: input, shape index: {}]   ;;  %s3234_s14 = inlined_call_operand.vmem [shape: f32[8,16,4], index: 14, kind: output, shape index: {}]  }
   0x1   :  { %s26_s15 = sshll.u32 %s3220_s0, 4  ;;  %s27_s15 = int_to_ptr.vmem [resolvable:$true] %s26_s15 }
   0x2   :  { %20 = vsyncpa [#allocation5], 0  ;;  %s35_s18 = sshll.u32 %s3221_s1, 4  ;;  %s2306_s19 = smov [#allocation2]   ;;  %s36_s18 = int_to_ptr.vmem [resolvable:$true] %s35_s18 }
   0x3   :  { %29 = dma.vmem_to_smem %s27_s15, 16, %s2306_s19, [#allocation3]  }
   0x4   :  { %s2307_s20 = smov [#allocation4]  }
   0x5   :  { %38 = dma.vmem_to_smem %s36_s18, 16, %s2307_s20, [#allocation5]  }
   0x6   :  { %2274 = dma.done.wait [#allocation3], 16  }
   0x7   :  { %2275 = vsyncadd [#allocation3], 4294967280 }
   0x8   :  { %2276 = dma.done.wait [#allocation5], 16  }
   0x9   :  { %2277 = vsyncadd [#allocation5], 4294967280 }
   0xa   :  { %71 = sfence }
   0xb   :  { %v2396_v0 = vld [vmem:[%s3226_s6 + $0x18] sm:$0xff]  ;;  %v2401_v1 = vld [vmem:[%s3226_s6 + $0x10] sm:$0xff]  ;;  %v2408_v2 = vld [vmem:[%s3226_s6 + $0x8] sm:$0xff]  ;;  %vm132_vm0 = vcmask 261120   ;;  %vm284_vm1 = vcmask 1043456   ;;  %v2308_v32 = vmov 0.0  }
   0xc   :  { %151 = vmatpush.msra.mxu0 %v2396_v0  ;;  %2060 = vmatpush.msra.mxu1 %v2396_v0  ;;  %v2415_v3 = vld [vmem:[%s3226_s6] sm:$0xff]  ;;  %v2427_v5 = vld [vmem:[%s3222_s2 + $0x8] sm:$0xff]  ;;  %v2438_v6 = vld [vmem:[%s3226_s6 + $0x38] sm:$0xff]  ;;  %vm226_vm2 = vcmask 31744  }
   0xd   :  { %v2421_v4 = vld [vmem:[%s3222_s2] sm:$0xff]  ;;  %v2444_v7 = vld [vmem:[%s3226_s6 + $0x30] sm:$0xff]  ;;  %v2449_v8 = vld [vmem:[%s3226_s6 + $0x28] sm:$0xff] }
   0xe   :  { %152 = vmatpush.msra.mxu0 %v2401_v1  ;;  %2061 = vmatpush.msra.mxu1 %v2401_v1  ;;  %v2455_v9 = vld [vmem:[%s3226_s6 + $0x20] sm:$0xff]  ;;  %v2467_v11 = vld [vmem:[%s3231_s11 + $0x18] sm:$0xff]  ;;  %v2472_v12 = vld [vmem:[%s3231_s11 + $0x10] sm:$0xff] }
   0xf   :  { %v2462_v10 = vld [vmem:[%s3232_s12] sm:$0xf]  ;;  %247 = vmatpush.msra.mxu3 %v2467_v11  ;;  %v2480_v13 = vld [vmem:[%s3230_s10 + $0x18] sm:$0xff]  ;;  %v2485_v14 = vld [vmem:[%s3231_s11 + $0x8] sm:$0xff] }
  0x10   :  { %153 = vmatpush.msra.mxu0 %v2408_v2  ;;  %2062 = vmatpush.msra.mxu1 %v2408_v2  ;;  %v2493_v15 = vld [vmem:[%s3227_s7] ss:$0 sm:$0xff]  ;;  %v2502_v22 = vld [vmem:[%s3228_s8 + $0x18] sm:$0xff]  ;;  %v2521_v25 = vld [vmem:[%s3230_s10 + $0x10] sm:$0xff] }
  0x11   :  { %248 = vmatpush.msra.mxu3 %v2472_v12  ;;  %v2507_v23 = vld [vmem:[%s3231_s11] sm:$0xff]  ;;  %215 = vmatpush.msra.mxu2 %v2502_v22  ;;  %v2526_v26 = vld [vmem:[%s3228_s8 + $0x10] sm:$0xff]  ;;  %v2533_v27 = vld [vmem:[%s3230_s10 + $0x8] sm:$0xff] }
  0x12   :  { %154 = vmatpush.msra.mxu0 %v2415_v3  ;;  %2063 = vmatpush.msra.mxu1 %v2415_v3  ;;  %v2514_v24 = vld [vmem:[%s3223_s3] sm:$0xff]  ;;  %v2538_v28 = vld [vmem:[%s3228_s8 + $0x8] sm:$0xff] }
  0x13   :  { %1957 = vmatmul.msk.f32.vlgmr.msra.gmra.mxu0 %vm132_vm0, %v2421_v4  ;;  %1958 = vmatmul.msk.f32.vlgmr.msra.gmra.mxu1 %vm132_vm0, %v2427_v5  ;;  %v2545_v29 = vld [vmem:[%s3230_s10] sm:$0xff]  ;;  %v2557_v31 = vld [vmem:[%s3223_s3 + $0x8] sm:$0xff]  ;;  %s477_s3 = sld [smem:[#allocation4]] }
  0x14   :  { %182 = vmatpush.msrb.mxu1 %v2438_v6  ;;  %270 = vmatpush.msrb.mxu0 %v2480_v13  ;;  %v2550_v30 = vld [vmem:[%s3228_s8] sm:$0xff] }
  0x15   :  { %249 = vmatpush.msra.mxu3 %v2485_v14  ;;  %216 = vmatpush.msra.mxu2 %v2526_v26  ;;  %v2566_v33 = vld [vmem:[%s3227_s7 + $0x1] ss:$0 sm:$0xff]  ;;  %s481_s7 = sld [smem:[#allocation2]]  ;;  %v2587_v46 = vld [vmem:[%s3233_s13] ss:$0 sm:$0xff] }
  0x16   :  { %183 = vmatpush.msrb.mxu1 %v2444_v7  ;;  %271 = vmatpush.msrb.mxu0 %v2521_v25  ;;  %v2597_v48 = vld [vmem:[%s3229_s9] ss:$0 sm:$0xff] }
  0x17   :  { %250 = vmatpush.msra.mxu3 %v2507_v23  ;;  %217 = vmatpush.msra.mxu2 %v2538_v28 }
  0x18   :  { %184 = vmatpush.msrb.mxu1 %v2449_v8  ;;  %1963 = vmatmul.msk.f32.vlgmr.msra.gmra.mxu3 %vm132_vm0, %v2514_v24 }
  0x19   :  { %272 = vmatpush.msrb.mxu0 %v2533_v27  ;;  %218 = vmatpush.msra.mxu2 %v2550_v30  ;;  %p478_p0 = scmp.eq.s32.totalorder %s477_s3, 1 }
  0x1a   :  { %185 = vmatpush.msrb.mxu1 %v2455_v9 }
  0x1b   :  { %273 = vmatpush.msrb.mxu0 %v2545_v29  ;;  %s479_s16 = scalar_select %p478_p0, 1, 0 }
  0x1c   :  { %1967 = vmatpush.msk.msra.mxu1 %vm284_vm1, %v2462_v10  ;;  %s1975_s2 = sshll.u32 %s481_s7, 4 }
  0x1d   :  { %s480_s17 = scvt.s32.f32 %s479_s16  ;;  %s483_s22 = scalar_lea.vmem %s3225_s5, %s1975_s2 }
  0x1e   :  { %v484_v49 = vld [vmem:[%s483_s22] sm:$0xff] }
  0x1f   :  { %s2592_s0 = ssub.f32 1.0, %s480_s17  ;;  %v486_v50 = vstv %s480_s17 }
  0x20   :  { %1964 = vmatmul.msk.f32.gmra.mxu3 %vm132_vm0, %v2557_v31  ;;  %v487_v57 = vmul.f32 %v486_v50, %v484_v49 }
  0x21   :  { %v490_v53 = vstv %s2592_s0 }
  0x90   :  { %v156_v16 = vpop.f32.mrf.mxu0  ;;  %v159_v18 = vpop.f32.mrf.mxu1 }
  0x91   :  { %v157_v17 = vadd.f32 %v2493_v15, %v156_v16  ;;  %v160_v19 = vadd.f32 %v2493_v15, %v159_v18  ;;  %v2621_v16 = vld [vmem:[%s3231_s11 + $0x30] sm:$0xff] }
  0x92   :  { %v2628_v18 = vld [vmem:[%s3230_s10 + $0x30] sm:$0xff] }
  0x93   :  { %2135 = vtanh.f32 %v157_v17  ;;  %v485_v17 = vld [vmem:[%s483_s22 + $0x8] sm:$0xff] }
  0x94   :  { %2137 = vtanh.f32 %v160_v19 }
  0x99   :  { %v2136_v20 = vpop.eup %2135 }
  0x9a   :  { %1959 = vmatmul.msk.f32.vlgmr.msrb.gmra.mxu1 %vm132_vm0, %v2136_v20  ;;  %v2138_v21 = vpop.eup %2137  ;;  %v2634_v20 = vld [vmem:[%s3231_s11 + $0x28] sm:$0xff] }
  0x9b   :  { %v252_v42 = vpop.f32.mrf.mxu3 }
  0xa2   :  { %1960 = vmatmul.msk.f32.gmra.mxu1 %vm132_vm0, %v2138_v21  ;;  %v2639_v21 = vld [vmem:[%s3230_s10 + $0x28] sm:$0xff] }
  0xa3   :  { %v255_v54 = vpop.f32.mrf.mxu3 }
  0xaa   :  { %304 = vmatmul.f32.vlgmr.msra.gmra.mxu1 %v2308_v32 }
  0xb2   :  { %307 = vmatmul.f32.gmra.mxu1 %v2308_v32 }
 0x117   :  { %v187_v34 = vpop.f32.mrf.mxu1 }
 0x118   :  { %v188_v35 = vadd.f32 %v2566_v33, %v187_v34  ;;  %v2644_v34 = vld [vmem:[%s3232_s12 + $0x4] sm:$0xf] }
 0x119   :  { %1974 = vmatpush.msk.msra.mxu0 %vm284_vm1, %v2644_v34 }
 0x11a   :  { %v193_v36 = vmul.f32 0.01, %v188_v35 }
 0x11c   :  { %v2570_v37 = vadd.f32 %v193_v36, %v2421_v4  ;;  %v2611_v4 = vld [vmem:[%s3231_s11 + $0x38] sm:$0xff] }
 0x11d   :  { %383 = vmatpush.msrb.mxu2 %v2611_v4 }
 0x11e   :  { %1961 = vmatmul.msk.f32.vlgmr.msra.gmra.mxu2 %vm132_vm0, %v2570_v37  ;;  %1965 = vmatmul.msk.f32.vlgmr.msrb.gmra.mxu0 %vm132_vm0, %v2570_v37 }
 0x11f   :  { %v190_v38 = vpop.f32.mrf.mxu1  ;;  %384 = vmatpush.msrb.mxu2 %v2621_v16 }
 0x120   :  { %v191_v39 = vadd.f32 %v2566_v33, %v190_v38 }
 0x121   :  { %385 = vmatpush.msrb.mxu2 %v2634_v20 }
 0x122   :  { %v194_v40 = vmul.f32 0.01, %v191_v39 }
 0x124   :  { %v2578_v41 = vadd.f32 %v194_v40, %v2427_v5  ;;  %v2616_v5 = vld [vmem:[%s3230_s10 + $0x38] sm:$0xff]  ;;  %v488_v40 = vmul.f32 %v486_v50, %v485_v17 }
 0x125   :  { %412 = vmatpush.msrb.mxu3 %v2616_v5 }
 0x126   :  { %1962 = vmatmul.msk.f32.gmra.mxu2 %vm132_vm0, %v2578_v41  ;;  %1966 = vmatmul.msk.f32.gmra.mxu0 %vm132_vm0, %v2578_v41 }
 0x127   :  { %v305_v43 = vpop.f32.mrf.mxu1  ;;  %413 = vmatpush.msrb.mxu3 %v2628_v18 }
 0x129   :  { %414 = vmatpush.msrb.mxu3 %v2639_v21 }
 0x12e   :  { %442 = vmatmul.f32.vlgmr.msra.gmra.mxu0 %v2308_v32 }
 0x12f   :  { %v308_v59 = vpop.f32.mrf.mxu1 }
 0x136   :  { %445 = vmatmul.f32.gmra.mxu0 %v2308_v32 }
 0x19b   :  { %v275_v44 = vpop.f32.mrf.mxu0 }
 0x19c   :  { %v276_v45 = vadd.f32 %v275_v44, %v252_v42  ;;  %v2654_v42 = vld [vmem:[%s3231_s11 + $0x20] sm:$0xff] }
 0x19d   :  { %386 = vmatpush.msrb.mxu2 %v2654_v42 }
 0x19e   :  { %v311_v47 = vadd.f32 %v305_v43, %v276_v45  ;;  %v2659_v43 = vld [vmem:[%s3230_s10 + $0x20] sm:$0xff]  ;;  %s2309_s10 = smov 96  }
 0x19f   :  { %415 = vmatpush.msrb.mxu3 %v2659_v43 }
 0x1a0   :  { %v313_v51 = vadd.f32 %v2587_v46, %v311_v47 }
 0x1a1   :  { %v220_v52 = vpop.f32.mrf.mxu2 }
 0x1a2   :  { %v1968_v55 = vmul.f32 -1.442695, %v313_v51  ;;  %v221_v56 = vadd.f32 %v2597_v48, %v220_v52 }
 0x1a3   :  { %v278_v58 = vpop.f32.mrf.mxu0 }
 0x1a4   :  { %2139 = vpow2.f32 %v1968_v55  ;;  %227 = vst.msk [vmem:[%s3234_s14] sm:$0xff] %vm226_vm2, %v221_v56  ;;  %v491_v60 = vmul.f32 %v490_v53, %v221_v56  ;;  %v279_v61 = vadd.f32 %v278_v58, %v255_v54 }
 0x1a6   :  { %v2606_v62 = vadd.f32 %v491_v60, %v487_v57   ;;  %v312_v63 = vadd.f32 %v308_v59, %v279_v61 }
 0x1a8   :  { %v314_v19 = vadd.f32 %v2587_v46, %v312_v63 }
 0x1a9   :  { %v223_v35 = vpop.f32.mrf.mxu2 }
 0x1aa   :  { %v2140_v36 = vpop.eup %2139  ;;  %v1969_v38 = vmul.f32 -1.442695, %v314_v19  ;;  %v224_v39 = vadd.f32 %v2597_v48, %v223_v35 }
 0x1ab   :  { %v321_v44 = vadd.f32 1.0, %v2140_v36 }
 0x1ac   :  { %2141 = vpow2.f32 %v1969_v38  ;;  %228 = vst.msk [vmem:[%s3234_s14 + $0x8] sm:$0xff] %vm226_vm2, %v224_v39  ;;  %v492_v45 = vmul.f32 %v490_v53, %v224_v39 }
 0x1ad   :  { %2143 = vrcp.f32 %v321_v44  ;;  %v334_v55 = vand.u32 2147483648, %v321_v44  ;;  %v332_v53 = vand.u32 2147483647, %v321_v44  ;;  %vm328_vm4 = vweird.f32 %v321_v44 }
 0x1ae   :  { %v2670_v47 = vadd.f32 %v492_v45, %v488_v40  }
 0x1af   :  { %v335_v59 = vor.u32 1.1754944e-38, %v334_v55  ;;  %vm333_vm6 = vcmp.eq.f32.partialorder %v332_v53, 8.507059e+37 }
 0x1b2   :  { %v2142_v49 = vpop.eup %2141 }
 0x1b3   :  { %v2144_v50 = vpop.eup %2143  ;;  %v322_v51 = vadd.f32 1.0, %v2142_v49 }
 0x1b4   :  { %v324_v52 = vmul.f32 %v2144_v50, %v321_v44  ;;  %vm329_vm3 = vweird.f32 %v2144_v50 }
 0x1b5   :  { %2145 = vrcp.f32 %v322_v51  ;;  %vm330_vm5 = vmor %vm328_vm4, %vm329_vm3  ;;  %v349_v32 = vand.u32 2147483648, %v322_v51  ;;  %v347_v35 = vand.u32 2147483647, %v322_v51  ;;  %vm343_vm8 = vweird.f32 %v322_v51 }
 0x1b6   :  { %v325_v54 = vsub.f32 1.0, %v324_v52 }
 0x1b7   :  { %v350_v38 = vor.u32 1.1754944e-38, %v349_v32  ;;  %vm348_vm10 = vcmp.eq.f32.partialorder %v347_v35, 8.507059e+37 }
 0x1b8   :  { %v326_v56 = vmul.f32 %v2144_v50, %v325_v54  ;;  %v443_v54 = vpop.f32.mrf.mxu0 }
 0x1ba   :  { %v327_v57 = vadd.f32 %v2144_v50, %v326_v56 }
 0x1bb   :  { %v2146_v58 = vpop.eup %2145 }
 0x1bc   :  { %v331_v60 = vsel %vm330_vm5, %v2144_v50, %v327_v57  ;;  %v339_v61 = vmul.f32 %v2146_v58, %v322_v51  ;;  %vm344_vm7 = vweird.f32 %v2146_v58  ;;  %v2686_v57 = vld [vmem:[%s3233_s13 + $0x1] ss:$0 sm:$0xff]  ;;  %s2710_s13 = smov 1  }
 0x1bd   :  { %v336_v63 = vsel %vm333_vm6, %v335_v59, %v331_v60  ;;  %vm345_vm9 = vmor %vm343_vm8, %vm344_vm7 }
 0x1be   :  { %355 = vrot.lane.b32.xlu0 %v336_v63, %s2309_s10  ;;  %v340_v17 = vsub.f32 1.0, %v339_v61  ;;  %v455_v60 = vsub.f32 1.0, %v336_v63  ;;  %v459_v61 = vmul.f32 %v336_v63, %v2570_v37 }
 0x1c0   :  { %v341_v19 = vmul.f32 %v2146_v58, %v340_v17  ;;  %v446_v32 = vpop.f32.mrf.mxu0 }
 0x1c2   :  { %v342_v36 = vadd.f32 %v2146_v58, %v341_v19 }
 0x1c4   :  { %v346_v39 = vsel %vm345_vm9, %v2146_v58, %v342_v36 }
 0x1c5   :  { %v351_v40 = vsel %vm348_vm10, %v350_v38, %v346_v39 }
 0x1c6   :  { %357 = vrot.lane.b32.xlu0 %v351_v40, %s2309_s10 }
 0x230   :  { %v356_v44 = vpop.permute.xlu0 %355 }
 0x231   :  { %v361_v45 = vmul.f32 %v356_v44, %v2570_v37  ;;  %v363_v49 = vmul.f32 %v356_v44, %v2514_v24 }
 0x233   :  { %1970 = vmatmul.msk.f32.vlgmr.msrb.gmra.mxu2 %vm132_vm0, %v363_v49  ;;  %1972 = vmatmul.msk.f32.vlgmr.msrb.gmra.mxu3 %vm132_vm0, %v361_v45  ;;  %v456_v49 = vsub.f32 1.0, %v351_v40 }
 0x238   :  { %v358_v50 = vpop.permute.xlu0 %357 }
 0x239   :  { %v362_v52 = vmul.f32 %v358_v50, %v2578_v41  ;;  %v364_v51 = vmul.f32 %v358_v50, %v2557_v31  ;;  %v460_v50 = vmul.f32 %v351_v40, %v2578_v41 }
 0x23b   :  { %1971 = vmatmul.msk.f32.gmra.mxu2 %vm132_vm0, %v364_v51  ;;  %1973 = vmatmul.msk.f32.gmra.mxu3 %vm132_vm0, %v362_v52 }
 0x2b6   :  { %v388_v55 = vpop.f32.mrf.mxu2  ;;  %v417_v56 = vpop.f32.mrf.mxu3 }
 0x2b7   :  { %v418_v53 = vadd.f32 %v417_v56, %v388_v55  ;;  %v473_v55 = vmul.f32 %v336_v63, %v2514_v24 }
 0x2b9   :  { %v449_v58 = vadd.f32 %v443_v54, %v418_v53 }
 0x2bb   :  { %v451_v59 = vadd.f32 %v2686_v57, %v449_v58 }
 0x2bd   :  { %v453_v17 = vand.u32 2147483647, %v451_v59  ;;  %v457_v19 = vmul.f32 %v455_v60, %v451_v59  ;;  %v474_v59 = vmul.f32 %v351_v40, %v2557_v31 }
 0x2be   :  { %v391_v35 = vpop.f32.mrf.mxu2  ;;  %v420_v36 = vpop.f32.mrf.mxu3 }
 0x2bf   :  { %v421_v38 = vadd.f32 %v420_v36, %v391_v35  ;;  %465 = vrot.lane.b32.xlu1 %v453_v17, %s2309_s10  ;;  %v461_v39 = vadd.f32 %v459_v61, %v457_v19  }
 0x2c1   :  { %v450_v44 = vadd.f32 %v446_v32, %v421_v38 }
 0x2c3   :  { %v452_v45 = vadd.f32 %v2686_v57, %v450_v44 }
 0x2c5   :  { %v454_v52 = vand.u32 2147483647, %v452_v45  ;;  %v458_v51 = vmul.f32 %v456_v49, %v452_v45 }
 0x2c7   :  { %467 = vrot.lane.b32.xlu1 %v454_v52, %s2309_s10  ;;  %v462_v37 = vadd.f32 %v460_v50, %v458_v51  }
 0x331   :  { %v466_v54 = vpop.permute.xlu1 %465 }
 0x332   :  { %v471_v56 = vmul.f32 %v466_v54, %v455_v60 }
 0x334   :  { %v475_v53 = vadd.f32 %v473_v55, %v471_v56  }
 0x339   :  { %v468_v58 = vpop.permute.xlu1 %467 }
 0x33a   :  { %v472_v61 = vmul.f32 %v468_v58, %v456_v49 }
 0x33c   :  { %v476_v17 = vadd.f32 %v474_v59, %v472_v61  }
 0x33d LB: > { %531 = vmatpush.msra.mxu0 %v2396_v0  ;;  %2064 = vmatpush.msra.mxu3 %v2396_v0  ;;  %s1976_s23 = sshll.u32 %s2304_s13, 4  ;;  %v2310_v31 = vmov 0   ;;  %s1887_s9 = sld [smem:[#allocation4 + %s2304_s13]]  ;;  %s2304_s13 = sphi %s2710_s13, %s500_s13   ;;  %v2300_v39 = vphi %v461_v39, %v1871_v39   ;;  %v2296_v37 = vphi %v462_v37, %v1872_v37   ;;  %v2292_v53 = vphi %v475_v53, %v1885_v53   ;;  %v2288_v17 = vphi %v476_v17, %v1886_v17   ;;  %v2284_v62 = vphi %v2606_v62, %v3235_v62   ;;  %v2280_v47 = vphi %v2670_v47, %v3182_v47  }
 0x33e   : > { %562 = vmatpush.msra.mxu1 %v2438_v6  ;;  %607 = vmatpush.msra.mxu2 %v2396_v0  ;;  %s508_s25 = scalar_lea.vmem %s3224_s4, %s1976_s23  ;;  %s1891_s6 = sld [smem:[#allocation2 + %s2304_s13]] }
 0x33f   : > { %532 = vmatpush.msra.mxu0 %v2401_v1  ;;  %2065 = vmatpush.msra.mxu3 %v2401_v1  ;;  %v509_v24 = vld [vmem:[%s508_s25] sm:$0xff]  ;;  %v510_v40 = vld [vmem:[%s508_s25 + $0x8] sm:$0xff]  ;;  %s1640_s16 = scalar_lea.vmem %s3234_s14, %s1976_s23  ;;  %s2311_s17 = smov 96  }
 0x340   : > { %563 = vmatpush.msra.mxu1 %v2444_v7  ;;  %608 = vmatpush.msra.mxu2 %v2401_v1  ;;  %v2783_v41 = vmul.f32 0.25, %v509_v24  ;;  %v2787_v60 = vmul.f32 0.25, %v510_v40  ;;  %s500_s13 = sadd.s32 1, %s2304_s13  }
 0x341   : > { %533 = vmatpush.msra.mxu0 %v2408_v2  ;;  %2066 = vmatpush.msra.mxu3 %v2408_v2  ;;  %p497_p2 = scmp.ge.s32.totalorder %s500_s13, 8  }
 0x342   : > { %564 = vmatpush.msra.mxu1 %v2449_v8  ;;  %609 = vmatpush.msra.mxu2 %v2408_v2  ;;  %v573_v63 = vmul.f32 0.5, %v2783_v41  ;;  %v574_v32 = vmul.f32 0.5, %v2787_v60 }
 0x343   : > { %534 = vmatpush.msra.mxu0 %v2415_v3  ;;  %2067 = vmatpush.msra.mxu3 %v2415_v3  ;;  %p1888_p1 = scmp.eq.s32.totalorder %s1887_s9, 1 }
 0x344   : > { %1977 = vmatmul.msk.f32.vlgmr.msra.gmra.mxu0 %vm132_vm0, %v2300_v39  ;;  %1978 = vmatmul.msk.f32.vlgmr.msra.gmra.mxu3 %vm132_vm0, %v2296_v37  ;;  %s2059_s28 = sshll.u32 %s1891_s6, 4 }
 0x345   : > { %565 = vmatpush.msra.mxu1 %v2455_v9  ;;  %610 = vmatpush.msra.mxu2 %v2415_v3  ;;  %s1889_s26 = scalar_select %p1888_p1, 1, 0 }
 0x346   : > { %638 = vmatpush.msrb.mxu3 %v2438_v6  ;;  %671 = vmatpush.msrb.mxu0 %v2396_v0  ;;  %s1893_s15 = scalar_lea.vmem %s3225_s5, %s2059_s28 }
 0x347   : > { %702 = vmatpush.msrb.mxu1 %v2438_v6  ;;  %745 = vmatpush.msrb.mxu2 %v2396_v0  ;;  %s1890_s27 = scvt.s32.f32 %s1889_s26 }
 0x348   : > { %639 = vmatpush.msrb.mxu3 %v2444_v7  ;;  %672 = vmatpush.msrb.mxu0 %v2401_v1 }
 0x349   : > { %703 = vmatpush.msrb.mxu1 %v2444_v7  ;;  %746 = vmatpush.msrb.mxu2 %v2401_v1  ;;  %s1899_s8 = ssub.f32 1.0, %s1890_s27 }
 0x34a   : > { %640 = vmatpush.msrb.mxu3 %v2449_v8  ;;  %673 = vmatpush.msrb.mxu0 %v2408_v2 }
 0x34b   : > { %704 = vmatpush.msrb.mxu1 %v2449_v8  ;;  %747 = vmatpush.msrb.mxu2 %v2408_v2 }
 0x34c   : > { %641 = vmatpush.msrb.mxu3 %v2455_v9  ;;  %674 = vmatpush.msrb.mxu0 %v2415_v3 }
 0x34d   : > { %705 = vmatpush.msrb.mxu1 %v2455_v9  ;;  %748 = vmatpush.msrb.mxu2 %v2415_v3 }
 0x34e   : > { %776 = vmatpush.msra.mxu3 %v2438_v6  ;;  %831 = vmatpush.msra.mxu0 %v2396_v0 }
 0x34f   : > { %2147 = vset.pattern.permute.xlu0 %v2310_v31  ;;  %2148 = vset.pattern.permute.xlu1 %v2310_v31 }
 0x350   : > { %777 = vmatpush.msra.mxu3 %v2444_v7  ;;  %832 = vmatpush.msra.mxu0 %v2401_v1 }
 0x351   : > { %2149 = vset.pattern.permute.xlu2 %v2310_v31  ;;  %715 = vperm.xlu1 %2148, %v2783_v41  }
 0x352   : > { %778 = vmatpush.msra.mxu3 %v2449_v8  ;;  %833 = vmatpush.msra.mxu0 %v2408_v2 }
 0x353   : > { %577 = vperm.xlu0 %2147, %v573_v63  }
 0x354   : > { %779 = vmatpush.msra.mxu3 %v2455_v9  ;;  %834 = vmatpush.msra.mxu0 %v2415_v3 }
 0x359   : > { %720 = vperm.xlu1 %2148, %v2787_v60  }
 0x35b   : > { %582 = vperm.xlu0 %2147, %v574_v32  }
 0x3c1   : > { %v536_v19 = vpop.f32.mrf.mxu0 }
 0x3c2   : > { %v537_v35 = vadd.f32 %v2493_v15, %v536_v19 }
 0x3c4   : > { %2150 = vtanh.f32 %v537_v35 }
 0x3c5   : > { %v2799_v49 = vpop.permute.xlu0 %577 }
 0x3c7   : > { %v539_v36 = vpop.f32.mrf.mxu3 }
 0x3c8   : > { %v540_v38 = vadd.f32 %v2493_v15, %v539_v36 }
 0x3ca   : > { %v2151_v44 = vpop.eup %2150  ;;  %2152 = vtanh.f32 %v540_v38 }
 0x3cb   : > { %1979 = vmatmul.msk.f32.vlgmr.msra.gmra.mxu1 %vm132_vm0, %v2151_v44 }
 0x3cc   : > { %862 = vmatpush.msra.mxu1 %v2438_v6 }
 0x3cd   : > { %v2809_v58 = vpop.permute.xlu0 %582 }
 0x3ce   : > { %863 = vmatpush.msra.mxu1 %v2444_v7 }
 0x3d0   : > { %v2153_v45 = vpop.eup %2152  ;;  %864 = vmatpush.msra.mxu1 %v2449_v8 }
 0x3d2   : > { %865 = vmatpush.msra.mxu1 %v2455_v9 }
 0x3d3   : > { %1980 = vmatmul.msk.f32.gmra.mxu1 %vm132_vm0, %v2153_v45 }
 0x448   : > { %v567_v50 = vpop.f32.mrf.mxu1 }
 0x449   : > { %v568_v52 = vadd.f32 %v2566_v33, %v567_v50 }
 0x44b   : > { %v585_v51 = vmul.f32 %v2799_v49, %v568_v52 }
 0x44d   : > { %v587_v54 = vadd.f32 %v2300_v39, %v585_v51 }
 0x44f   : > { %1981 = vmatmul.msk.f32.vlgmr.msra.gmra.mxu2 %vm132_vm0, %v587_v54 }
 0x450   : > { %v570_v55 = vpop.f32.mrf.mxu1  ;;  %895 = vmatpush.msra.mxu2 %v2396_v0 }
 0x451   : > { %v2807_v56 = vadd.f32 %v2566_v33, %v570_v55 }
 0x452   : > { %896 = vmatpush.msra.mxu2 %v2401_v1 }
 0x453   : > { %v586_v59 = vmul.f32 %v2809_v58, %v2807_v56 }
 0x454   : > { %897 = vmatpush.msra.mxu2 %v2408_v2 }
 0x455   : > { %v588_v61 = vadd.f32 %v2296_v37, %v586_v59 }
 0x456   : > { %898 = vmatpush.msra.mxu2 %v2415_v3 }
 0x457   : > { %1982 = vmatmul.msk.f32.gmra.mxu2 %vm132_vm0, %v588_v61 }
 0x4d2   : > { %v612_v24 = vpop.f32.mrf.mxu2 }
 0x4d3   : > { %v613_v31 = vadd.f32 %v2493_v15, %v612_v24 }
 0x4d5   : > { %2154 = vtanh.f32 %v613_v31 }
 0x4da   : > { %v615_v63 = vpop.f32.mrf.mxu2 }
 0x4db   : > { %v2155_v40 = vpop.eup %2154  ;;  %v616_v32 = vadd.f32 %v2493_v15, %v615_v63 }
 0x4dc   : > { %1983 = vmatmul.msk.f32.vlgmr.msrb.gmra.mxu3 %vm132_vm0, %v2155_v40 }
 0x4dd   : > { %2156 = vtanh.f32 %v616_v32  ;;  %926 = vmatpush.msrb.mxu3 %v2438_v6  ;;  %v2846_v32 = vpop.permute.xlu1 %715 }
 0x4df   : > { %927 = vmatpush.msrb.mxu3 %v2444_v7 }
 0x4e1   : > { %928 = vmatpush.msrb.mxu3 %v2449_v8 }
 0x4e3   : > { %v2157_v19 = vpop.eup %2156  ;;  %929 = vmatpush.msrb.mxu3 %v2455_v9 }
 0x4e4   : > { %1984 = vmatmul.msk.f32.gmra.mxu3 %vm132_vm0, %v2157_v19 }
 0x55f   : > { %v643_v35 = vpop.f32.mrf.mxu3 }
 0x560   : > { %v644_v36 = vadd.f32 %v2566_v33, %v643_v35 }
 0x562   : > { %v649_v38 = vmul.f32 %v644_v36, %v2799_v49  ;;  %v789_v40 = vmul.f32 2.0, %v644_v36 }
 0x564   : > { %v651_v44 = vadd.f32 %v2300_v39, %v649_v38  ;;  %v791_v38 = vadd.f32 %v789_v40, %v568_v52  ;;  %v787_v40 = vmul.f32 0.16666667, %v2783_v41 }
 0x566   : > { %1985 = vmatmul.msk.f32.vlgmr.msrb.gmra.mxu0 %vm132_vm0, %v651_v44  ;;  %801 = vperm.xlu2 %2149, %v787_v40  }
 0x567   : > { %v646_v45 = vpop.f32.mrf.mxu3  ;;  %959 = vmatpush.msrb.mxu0 %v2396_v0 }
 0x568   : > { %v647_v50 = vadd.f32 %v2566_v33, %v646_v45 }
 0x569   : > { %960 = vmatpush.msrb.mxu0 %v2401_v1 }
 0x56a   : > { %v650_v51 = vmul.f32 %v647_v50, %v2809_v58 }
 0x56b   : > { %961 = vmatpush.msrb.mxu0 %v2408_v2 }
 0x56c   : > { %v652_v54 = vadd.f32 %v2296_v37, %v650_v51 }
 0x56d   : > { %962 = vmatpush.msrb.mxu0 %v2415_v3 }
 0x56e   : > { %1986 = vmatmul.msk.f32.gmra.mxu0 %vm132_vm0, %v652_v54 }
 0x5e3   : > { %v676_v55 = vpop.f32.mrf.mxu0 }
 0x5e4   : > { %v677_v59 = vadd.f32 %v2493_v15, %v676_v55  ;;  %v790_v55 = vmul.f32 2.0, %v647_v50 }
 0x5e6   : > { %2158 = vtanh.f32 %v677_v59  ;;  %v792_v52 = vadd.f32 %v790_v55, %v2807_v56  ;;  %v2874_v55 = vpop.permute.xlu2 %801 }
 0x5eb   : > { %v679_v61 = vpop.f32.mrf.mxu0 }
 0x5ec   : > { %v2159_v24 = vpop.eup %2158  ;;  %v680_v31 = vadd.f32 %v2493_v15, %v679_v61  ;;  %v2854_v61 = vpop.permute.xlu1 %720 }
 0x5ed   : > { %1987 = vmatmul.msk.f32.vlgmr.msrb.gmra.mxu1 %vm132_vm0, %v2159_v24 }
 0x5ee   : > { %2160 = vtanh.f32 %v680_v31  ;;  %990 = vmatpush.msrb.mxu1 %v2438_v6 }
 0x5f0   : > { %991 = vmatpush.msrb.mxu1 %v2444_v7 }
 0x5f2   : > { %992 = vmatpush.msrb.mxu1 %v2449_v8 }
 0x5f4   : > { %v2161_v63 = vpop.eup %2160  ;;  %993 = vmatpush.msrb.mxu1 %v2455_v9 }
 0x5f5   : > { %1988 = vmatmul.msk.f32.gmra.mxu1 %vm132_vm0, %v2161_v63 }
 0x66a   : > { %v707_v19 = vpop.f32.mrf.mxu1 }
 0x66b   : > { %v708_v35 = vadd.f32 %v2566_v33, %v707_v19  ;;  %v788_v19 = vmul.f32 0.16666667, %v2787_v60 }
 0x66d   : > { %v723_v44 = vmul.f32 %v2846_v32, %v708_v35  ;;  %v793_v45 = vmul.f32 2.0, %v708_v35  ;;  %806 = vperm.xlu2 %2149, %v788_v19  }
 0x66f   : > { %v725_v51 = vadd.f32 %v2300_v39, %v723_v44  ;;  %v795_v54 = vadd.f32 %v793_v45, %v791_v38 }
 0x671   : > { %1989 = vmatmul.msk.f32.vlgmr.msrb.gmra.mxu2 %vm132_vm0, %v725_v51 }
 0x672   : > { %v710_v59 = vpop.f32.mrf.mxu1  ;;  %1023 = vmatpush.msrb.mxu2 %v2396_v0 }
 0x673   : > { %v711_v36 = vadd.f32 %v2566_v33, %v710_v59 }
 0x674   : > { %1024 = vmatpush.msrb.mxu2 %v2401_v1 }
 0x675   : > { %v724_v24 = vmul.f32 %v2854_v61, %v711_v36  ;;  %v794_v31 = vmul.f32 2.0, %v711_v36 }
 0x676   : > { %1025 = vmatpush.msrb.mxu2 %v2408_v2 }
 0x677   : > { %v726_v50 = vadd.f32 %v2296_v37, %v724_v24  ;;  %v796_v63 = vadd.f32 %v794_v31, %v792_v52 }
 0x678   : > { %1026 = vmatpush.msrb.mxu2 %v2415_v3 }
 0x679   : > { %1990 = vmatmul.msk.f32.gmra.mxu2 %vm132_vm0, %v726_v50 }
 0x6c7   : > { %v2884_v40 = vpop.permute.xlu2 %806 }
 0x6f4   : > { %v750_v35 = vpop.f32.mrf.mxu2 }
 0x6f5   : > { %v751_v56 = vadd.f32 %v2493_v15, %v750_v35 }
 0x6f7   : > { %2162 = vtanh.f32 %v751_v56 }
 0x6fc   : > { %v753_v38 = vpop.f32.mrf.mxu2 }
 0x6fd   : > { %v2163_v44 = vpop.eup %2162  ;;  %v754_v45 = vadd.f32 %v2493_v15, %v753_v38 }
 0x6fe   : > { %1991 = vmatmul.msk.f32.vlgmr.msra.gmra.mxu3 %vm132_vm0, %v2163_v44 }
 0x6ff   : > { %2164 = vtanh.f32 %v754_v45  ;;  %1054 = vmatpush.msra.mxu3 %v2438_v6 }
 0x701   : > { %1055 = vmatpush.msra.mxu3 %v2444_v7 }
 0x703   : > { %1056 = vmatpush.msra.mxu3 %v2449_v8 }
 0x705   : > { %v2165_v41 = vpop.eup %2164  ;;  %1057 = vmatpush.msra.mxu3 %v2455_v9 }
 0x706   : > { %1992 = vmatmul.msk.f32.gmra.mxu3 %vm132_vm0, %v2165_v41 }
 0x781   : > { %v781_v60 = vpop.f32.mrf.mxu3 }
 0x782   : > { %v782_v51 = vadd.f32 %v2566_v33, %v781_v60 }
 0x784   : > { %v797_v59 = vadd.f32 %v795_v54, %v782_v51 }
 0x786   : > { %v809_v36 = vmul.f32 %v2874_v55, %v797_v59 }
 0x788   : > { %v2878_v52 = vadd.f32 %v2300_v39, %v809_v36 }
 0x789   : > { %v784_v24 = vpop.f32.mrf.mxu3 }
 0x78a   : > { %v785_v31 = vadd.f32 %v2566_v33, %v784_v24  ;;  %1993 = vmatmul.msk.f32.vlgmr.msra.gmra.mxu0 %vm132_vm0, %v2878_v52 }
 0x78b   : > { %1097 = vmatpush.msra.mxu0 %v2396_v0 }
 0x78c   : > { %v798_v50 = vadd.f32 %v796_v63, %v785_v31 }
 0x78d   : > { %1098 = vmatpush.msra.mxu0 %v2401_v1 }
 0x78e   : > { %v810_v54 = vmul.f32 %v2884_v40, %v798_v50 }
 0x78f   : > { %1099 = vmatpush.msra.mxu0 %v2408_v2 }
 0x790   : > { %v2890_v39 = vadd.f32 %v2296_v37, %v810_v54 }
 0x791   : > { %1100 = vmatpush.msra.mxu0 %v2415_v3 }
 0x792   : > { %1994 = vmatmul.msk.f32.gmra.mxu0 %vm132_vm0, %v2890_v39 }
 0x807   : > { %v836_v19 = vpop.f32.mrf.mxu0 }
 0x808   : > { %v837_v35 = vadd.f32 %v2493_v15, %v836_v19 }
 0x80a   : > { %2166 = vtanh.f32 %v837_v35 }
 0x80f   : > { %v839_v63 = vpop.f32.mrf.mxu0 }
 0x810   : > { %v2167_v56 = vpop.eup %2166  ;;  %v840_v38 = vadd.f32 %v2493_v15, %v839_v63 }
 0x811   : > { %1995 = vmatmul.msk.f32.vlgmr.msra.gmra.mxu1 %vm132_vm0, %v2167_v56 }
 0x812   : > { %2168 = vtanh.f32 %v840_v38  ;;  %1128 = vmatpush.msra.mxu1 %v2438_v6 }
 0x814   : > { %1129 = vmatpush.msra.mxu1 %v2444_v7 }
 0x816   : > { %1130 = vmatpush.msra.mxu1 %v2449_v8 }
 0x818   : > { %v2169_v37 = vpop.eup %2168  ;;  %1131 = vmatpush.msra.mxu1 %v2455_v9 }
 0x819   : > { %1996 = vmatmul.msk.f32.gmra.mxu1 %vm132_vm0, %v2169_v37 }
 0x88e   : > { %v867_v44 = vpop.f32.mrf.mxu1 }
 0x88f   : > { %v868_v45 = vadd.f32 %v2566_v33, %v867_v44 }
 0x891   : > { %v873_v41 = vmul.f32 %v868_v45, %v2799_v49 }
 0x893   : > { %v875_v60 = vadd.f32 %v873_v41, %v2878_v52 }
 0x895   : > { %1997 = vmatmul.msk.f32.vlgmr.msra.gmra.mxu2 %vm132_vm0, %v875_v60 }
 0x896   : > { %v870_v51 = vpop.f32.mrf.mxu1  ;;  %1161 = vmatpush.msra.mxu2 %v2396_v0 }
 0x897   : > { %v2909_v59 = vadd.f32 %v2566_v33, %v870_v51 }
 0x898   : > { %1162 = vmatpush.msra.mxu2 %v2401_v1 }
 0x899   : > { %v874_v36 = vmul.f32 %v2909_v59, %v2809_v58 }
 0x89a   : > { %1163 = vmatpush.msra.mxu2 %v2408_v2 }
 0x89b   : > { %v876_v24 = vadd.f32 %v874_v36, %v2890_v39 }
 0x89c   : > { %1164 = vmatpush.msra.mxu2 %v2415_v3 }
 0x89d   : > { %1998 = vmatmul.msk.f32.gmra.mxu2 %vm132_vm0, %v876_v24 }
 0x918   : > { %v900_v31 = vpop.f32.mrf.mxu2 }
 0x919   : > { %v901_v50 = vadd.f32 %v2493_v15, %v900_v31 }
 0x91b   : > { %2170 = vtanh.f32 %v901_v50 }
 0x920   : > { %v903_v54 = vpop.f32.mrf.mxu2 }
 0x921   : > { %v2171_v19 = vpop.eup %2170  ;;  %v904_v35 = vadd.f32 %v2493_v15, %v903_v54 }
 0x922   : > { %1999 = vmatmul.msk.f32.vlgmr.msrb.gmra.mxu3 %vm132_vm0, %v2171_v19 }
 0x923   : > { %2172 = vtanh.f32 %v904_v35  ;;  %1192 = vmatpush.msrb.mxu3 %v2438_v6 }
 0x925   : > { %1193 = vmatpush.msrb.mxu3 %v2444_v7 }
 0x927   : > { %1194 = vmatpush.msrb.mxu3 %v2449_v8 }
 0x929   : > { %v2173_v63 = vpop.eup %2172  ;;  %1195 = vmatpush.msrb.mxu3 %v2455_v9 }
 0x92a   : > { %2000 = vmatmul.msk.f32.gmra.mxu3 %vm132_vm0, %v2173_v63 }
 0x9a5   : > { %v931_v56 = vpop.f32.mrf.mxu3 }
 0x9a6   : > { %v932_v38 = vadd.f32 %v2566_v33, %v931_v56 }
 0x9a8   : > { %v937_v37 = vmul.f32 %v932_v38, %v2799_v49  ;;  %v1065_v63 = vmul.f32 2.0, %v932_v38 }
 0x9aa   : > { %v939_v44 = vadd.f32 %v937_v37, %v2878_v52 }
 0x9ac   : > { %2001 = vmatmul.msk.f32.vlgmr.msrb.gmra.mxu0 %vm132_vm0, %v939_v44  ;;  %v1067_v44 = vadd.f32 %v1065_v63, %v868_v45 }
 0x9ad   : > { %v934_v41 = vpop.f32.mrf.mxu3  ;;  %1225 = vmatpush.msrb.mxu0 %v2396_v0 }
 0x9ae   : > { %v935_v60 = vadd.f32 %v2566_v33, %v934_v41 }
 0x9af   : > { %1226 = vmatpush.msrb.mxu0 %v2401_v1 }
 0x9b0   : > { %v938_v51 = vmul.f32 %v935_v60, %v2809_v58 }
 0x9b1   : > { %1227 = vmatpush.msrb.mxu0 %v2408_v2 }
 0x9b2   : > { %v940_v36 = vadd.f32 %v938_v51, %v2890_v39 }
 0x9b3   : > { %1228 = vmatpush.msrb.mxu0 %v2415_v3 }
 0x9b4   : > { %2002 = vmatmul.msk.f32.gmra.mxu0 %vm132_vm0, %v940_v36 }
 0xa29   : > { %v964_v24 = vpop.f32.mrf.mxu0 }
 0xa2a   : > { %v965_v31 = vadd.f32 %v2493_v15, %v964_v24 }
 0xa2c   : > { %2174 = vtanh.f32 %v965_v31  ;;  %v1066_v31 = vmul.f32 2.0, %v935_v60 }
 0xa2e   : > { %v1068_v38 = vadd.f32 %v1066_v31, %v2909_v59 }
 0xa31   : > { %v967_v50 = vpop.f32.mrf.mxu0 }
 0xa32   : > { %v2175_v54 = vpop.eup %2174  ;;  %v968_v19 = vadd.f32 %v2493_v15, %v967_v50 }
 0xa33   : > { %2003 = vmatmul.msk.f32.vlgmr.msrb.gmra.mxu1 %vm132_vm0, %v2175_v54 }
 0xa34   : > { %2176 = vtanh.f32 %v968_v19  ;;  %1256 = vmatpush.msrb.mxu1 %v2438_v6 }
 0xa36   : > { %1257 = vmatpush.msrb.mxu1 %v2444_v7 }
 0xa38   : > { %1258 = vmatpush.msrb.mxu1 %v2449_v8 }
 0xa3a   : > { %v2177_v35 = vpop.eup %2176  ;;  %1259 = vmatpush.msrb.mxu1 %v2455_v9 }
 0xa3b   : > { %2004 = vmatmul.msk.f32.gmra.mxu1 %vm132_vm0, %v2177_v35 }
 0xab0   : > { %v995_v56 = vpop.f32.mrf.mxu1 }
 0xab1   : > { %v996_v37 = vadd.f32 %v2566_v33, %v995_v56 }
 0xab3   : > { %v1001_v41 = vmul.f32 %v996_v37, %v2846_v32  ;;  %v1069_v51 = vmul.f32 2.0, %v996_v37 }
 0xab5   : > { %v1003_v36 = vadd.f32 %v1001_v41, %v2878_v52  ;;  %v1071_v24 = vadd.f32 %v1069_v51, %v1067_v44 }
 0xab7   : > { %2005 = vmatmul.msk.f32.vlgmr.msrb.gmra.mxu2 %vm132_vm0, %v1003_v36 }
 0xab8   : > { %v998_v50 = vpop.f32.mrf.mxu1  ;;  %1289 = vmatpush.msrb.mxu2 %v2396_v0 }
 0xab9   : > { %v999_v54 = vadd.f32 %v2566_v33, %v998_v50 }
 0xaba   : > { %1290 = vmatpush.msrb.mxu2 %v2401_v1 }
 0xabb   : > { %v1002_v45 = vmul.f32 %v999_v54, %v2854_v61  ;;  %v1070_v19 = vmul.f32 2.0, %v999_v54 }
 0xabc   : > { %1291 = vmatpush.msrb.mxu2 %v2408_v2 }
 0xabd   : > { %v1004_v35 = vadd.f32 %v1002_v45, %v2890_v39  ;;  %v1072_v63 = vadd.f32 %v1070_v19, %v1068_v38 }
 0xabe   : > { %1292 = vmatpush.msrb.mxu2 %v2415_v3 }
 0xabf   : > { %2006 = vmatmul.msk.f32.gmra.mxu2 %vm132_vm0, %v1004_v35 }
 0xb3a   : > { %v1028_v60 = vpop.f32.mrf.mxu2 }
 0xb3b   : > { %v1029_v56 = vadd.f32 %v2493_v15, %v1028_v60 }
 0xb3d   : > { %2178 = vtanh.f32 %v1029_v56 }
 0xb42   : > { %v1031_v37 = vpop.f32.mrf.mxu2 }
 0xb43   : > { %v2179_v44 = vpop.eup %2178  ;;  %v1032_v59 = vadd.f32 %v2493_v15, %v1031_v37 }
 0xb44   : > { %2007 = vmatmul.msk.f32.vlgmr.msra.gmra.mxu3 %vm132_vm0, %v2179_v44 }
 0xb45   : > { %2180 = vtanh.f32 %v1032_v59  ;;  %1320 = vmatpush.msra.mxu3 %v2438_v6 }
 0xb47   : > { %1321 = vmatpush.msra.mxu3 %v2444_v7 }
 0xb49   : > { %1322 = vmatpush.msra.mxu3 %v2449_v8 }
 0xb4b   : > { %v2181_v41 = vpop.eup %2180  ;;  %1323 = vmatpush.msra.mxu3 %v2455_v9 }
 0xb4c   : > { %2008 = vmatmul.msk.f32.gmra.mxu3 %vm132_vm0, %v2181_v41 }
 0xbc7   : > { %v1059_v51 = vpop.f32.mrf.mxu3 }
 0xbc8   : > { %v1060_v36 = vadd.f32 %v2566_v33, %v1059_v51 }
 0xbca   : > { %v1073_v31 = vadd.f32 %v1071_v24, %v1060_v36 }
 0xbcc   : > { %v1075_v50 = vmul.f32 %v1073_v31, %v2874_v55 }
 0xbce   : > { %v2970_v54 = vadd.f32 %v1075_v50, %v2878_v52 }
 0xbcf   : > { %v1062_v38 = vpop.f32.mrf.mxu3 }
 0xbd0   : > { %v1063_v45 = vadd.f32 %v2566_v33, %v1062_v38  ;;  %2009 = vmatmul.msk.f32.vlgmr.msra.gmra.mxu0 %vm132_vm0, %v2970_v54 }
 0xbd1   : > { %1363 = vmatpush.msra.mxu0 %v2396_v0 }
 0xbd2   : > { %v1074_v19 = vadd.f32 %v1072_v63, %v1063_v45 }
 0xbd3   : > { %1364 = vmatpush.msra.mxu0 %v2401_v1 }
 0xbd4   : > { %v1076_v35 = vmul.f32 %v1074_v19, %v2884_v40 }
 0xbd5   : > { %1365 = vmatpush.msra.mxu0 %v2408_v2 }
 0xbd6   : > { %v2980_v24 = vadd.f32 %v1076_v35, %v2890_v39 }
 0xbd7   : > { %1366 = vmatpush.msra.mxu0 %v2415_v3 }
 0xbd8   : > { %2010 = vmatmul.msk.f32.gmra.mxu0 %vm132_vm0, %v2980_v24 }
 0xc4d   : > { %v1102_v52 = vpop.f32.mrf.mxu0 }
 0xc4e   : > { %v1103_v60 = vadd.f32 %v2493_v15, %v1102_v52 }
 0xc50   : > { %2182 = vtanh.f32 %v1103_v60 }
 0xc55   : > { %v1105_v56 = vpop.f32.mrf.mxu0 }
 0xc56   : > { %v2183_v63 = vpop.eup %2182  ;;  %v1106_v37 = vadd.f32 %v2493_v15, %v1105_v56 }
 0xc57   : > { %2011 = vmatmul.msk.f32.vlgmr.msra.gmra.mxu1 %vm132_vm0, %v2183_v63 }
 0xc58   : > { %2184 = vtanh.f32 %v1106_v37  ;;  %1394 = vmatpush.msra.mxu1 %v2438_v6 }
 0xc5a   : > { %1395 = vmatpush.msra.mxu1 %v2444_v7 }
 0xc5c   : > { %1396 = vmatpush.msra.mxu1 %v2449_v8 }
 0xc5e   : > { %v2185_v39 = vpop.eup %2184  ;;  %1397 = vmatpush.msra.mxu1 %v2455_v9 }
 0xc5f   : > { %2012 = vmatmul.msk.f32.gmra.mxu1 %vm132_vm0, %v2185_v39 }
 0xcd4   : > { %v1133_v44 = vpop.f32.mrf.mxu1 }
 0xcd5   : > { %v1134_v59 = vadd.f32 %v2566_v33, %v1133_v44 }
 0xcd7   : > { %v1139_v41 = vmul.f32 %v1134_v59, %v2799_v49 }
 0xcd9   : > { %v1141_v51 = vadd.f32 %v1139_v41, %v2970_v54 }
 0xcdb   : > { %2013 = vmatmul.msk.f32.vlgmr.msra.gmra.mxu2 %vm132_vm0, %v1141_v51 }
 0xcdc   : > { %v1136_v36 = vpop.f32.mrf.mxu1  ;;  %1427 = vmatpush.msra.mxu2 %v2396_v0 }
 0xcdd   : > { %v2999_v31 = vadd.f32 %v2566_v33, %v1136_v36 }
 0xcde   : > { %1428 = vmatpush.msra.mxu2 %v2401_v1 }
 0xcdf   : > { %v1140_v50 = vmul.f32 %v2999_v31, %v2809_v58 }
 0xce0   : > { %1429 = vmatpush.msra.mxu2 %v2408_v2 }
 0xce1   : > { %v1142_v38 = vadd.f32 %v1140_v50, %v2980_v24 }
 0xce2   : > { %1430 = vmatpush.msra.mxu2 %v2415_v3 }
 0xce3   : > { %2014 = vmatmul.msk.f32.gmra.mxu2 %vm132_vm0, %v1142_v38 }
 0xd5e   : > { %v1166_v45 = vpop.f32.mrf.mxu2 }
 0xd5f   : > { %v1167_v19 = vadd.f32 %v2493_v15, %v1166_v45 }
 0xd61   : > { %2186 = vtanh.f32 %v1167_v19 }
 0xd66   : > { %v1169_v35 = vpop.f32.mrf.mxu2 }
 0xd67   : > { %v2187_v52 = vpop.eup %2186  ;;  %v1170_v60 = vadd.f32 %v2493_v15, %v1169_v35 }
 0xd68   : > { %2015 = vmatmul.msk.f32.vlgmr.msrb.gmra.mxu3 %vm132_vm0, %v2187_v52 }
 0xd69   : > { %2188 = vtanh.f32 %v1170_v60  ;;  %1458 = vmatpush.msrb.mxu3 %v2438_v6 }
 0xd6b   : > { %1459 = vmatpush.msrb.mxu3 %v2444_v7 }
 0xd6d   : > { %1460 = vmatpush.msrb.mxu3 %v2449_v8 }
 0xd6f   : > { %v2189_v56 = vpop.eup %2188  ;;  %1461 = vmatpush.msrb.mxu3 %v2455_v9 }
 0xd70   : > { %2016 = vmatmul.msk.f32.gmra.mxu3 %vm132_vm0, %v2189_v56 }
 0xdeb   : > { %v1197_v63 = vpop.f32.mrf.mxu3 }
 0xdec   : > { %v1198_v37 = vadd.f32 %v2566_v33, %v1197_v63 }
 0xdee   : > { %v1203_v39 = vmul.f32 %v1198_v37, %v2799_v49  ;;  %v1331_v56 = vmul.f32 2.0, %v1198_v37 }
 0xdf0   : > { %v1205_v44 = vadd.f32 %v1203_v39, %v2970_v54 }
 0xdf2   : > { %2017 = vmatmul.msk.f32.vlgmr.msrb.gmra.mxu0 %vm132_vm0, %v1205_v44  ;;  %v1333_v44 = vadd.f32 %v1331_v56, %v1134_v59 }
 0xdf3   : > { %v1200_v41 = vpop.f32.mrf.mxu3  ;;  %1491 = vmatpush.msrb.mxu0 %v2396_v0 }
 0xdf4   : > { %v1201_v51 = vadd.f32 %v2566_v33, %v1200_v41 }
 0xdf5   : > { %1492 = vmatpush.msrb.mxu0 %v2401_v1 }
 0xdf6   : > { %v1204_v36 = vmul.f32 %v1201_v51, %v2809_v58 }
 0xdf7   : > { %1493 = vmatpush.msrb.mxu0 %v2408_v2 }
 0xdf8   : > { %v1206_v50 = vadd.f32 %v1204_v36, %v2980_v24 }
 0xdf9   : > { %1494 = vmatpush.msrb.mxu0 %v2415_v3 }
 0xdfa   : > { %2018 = vmatmul.msk.f32.gmra.mxu0 %vm132_vm0, %v1206_v50 }
 0xe6f   : > { %v1230_v38 = vpop.f32.mrf.mxu0 }
 0xe70   : > { %v1231_v45 = vadd.f32 %v2493_v15, %v1230_v38 }
 0xe72   : > { %2190 = vtanh.f32 %v1231_v45  ;;  %v1332_v45 = vmul.f32 2.0, %v1201_v51 }
 0xe74   : > { %v1334_v37 = vadd.f32 %v1332_v45, %v2999_v31 }
 0xe77   : > { %v1233_v19 = vpop.f32.mrf.mxu0 }
 0xe78   : > { %v2191_v35 = vpop.eup %2190  ;;  %v1234_v52 = vadd.f32 %v2493_v15, %v1233_v19 }
 0xe79   : > { %2019 = vmatmul.msk.f32.vlgmr.msrb.gmra.mxu1 %vm132_vm0, %v2191_v35 }
 0xe7a   : > { %2192 = vtanh.f32 %v1234_v52  ;;  %1522 = vmatpush.msrb.mxu1 %v2438_v6 }
 0xe7c   : > { %1523 = vmatpush.msrb.mxu1 %v2444_v7 }
 0xe7e   : > { %1524 = vmatpush.msrb.mxu1 %v2449_v8 }
 0xe80   : > { %v2193_v60 = vpop.eup %2192  ;;  %1525 = vmatpush.msrb.mxu1 %v2455_v9 }
 0xe81   : > { %2020 = vmatmul.msk.f32.gmra.mxu1 %vm132_vm0, %v2193_v60 }
 0xef6   : > { %v1261_v63 = vpop.f32.mrf.mxu1 }
 0xef7   : > { %v1262_v39 = vadd.f32 %v2566_v33, %v1261_v63 }
 0xef9   : > { %v1267_v41 = vmul.f32 %v1262_v39, %v2846_v32  ;;  %v1335_v36 = vmul.f32 2.0, %v1262_v39 }
 0xefb   : > { %v1269_v50 = vadd.f32 %v1267_v41, %v2970_v54  ;;  %v1337_v38 = vadd.f32 %v1335_v36, %v1333_v44 }
 0xefd   : > { %2021 = vmatmul.msk.f32.vlgmr.msrb.gmra.mxu2 %vm132_vm0, %v1269_v50 }
 0xefe   : > { %v1264_v19 = vpop.f32.mrf.mxu1  ;;  %1555 = vmatpush.msrb.mxu2 %v2396_v0 }
 0xeff   : > { %v1265_v35 = vadd.f32 %v2566_v33, %v1264_v19 }
 0xf00   : > { %1556 = vmatpush.msrb.mxu2 %v2401_v1 }
 0xf01   : > { %v1268_v59 = vmul.f32 %v1265_v35, %v2854_v61  ;;  %v1336_v52 = vmul.f32 2.0, %v1265_v35 }
 0xf02   : > { %1557 = vmatpush.msrb.mxu2 %v2408_v2 }
 0xf03   : > { %v1270_v60 = vadd.f32 %v1268_v59, %v2980_v24  ;;  %v1338_v56 = vadd.f32 %v1336_v52, %v1334_v37 }
 0xf04   : > { %1558 = vmatpush.msrb.mxu2 %v2415_v3 }
 0xf05   : > { %2022 = vmatmul.msk.f32.gmra.mxu2 %vm132_vm0, %v1270_v60 }
 0xf80   : > { %v1294_v51 = vpop.f32.mrf.mxu2 }
 0xf81   : > { %v1295_v63 = vadd.f32 %v2493_v15, %v1294_v51 }
 0xf83   : > { %2194 = vtanh.f32 %v1295_v63 }
 0xf88   : > { %v1297_v39 = vpop.f32.mrf.mxu2 }
 0xf89   : > { %v2195_v44 = vpop.eup %2194  ;;  %v1298_v31 = vadd.f32 %v2493_v15, %v1297_v39 }
 0xf8a   : > { %2023 = vmatmul.msk.f32.vlgmr.msra.gmra.mxu3 %vm132_vm0, %v2195_v44 }
 0xf8b   : > { %2196 = vtanh.f32 %v1298_v31  ;;  %1586 = vmatpush.msra.mxu3 %v2438_v6 }
 0xf8d   : > { %1587 = vmatpush.msra.mxu3 %v2444_v7 }
 0xf8f   : > { %1588 = vmatpush.msra.mxu3 %v2449_v8 }
 0xf91   : > { %v2197_v41 = vpop.eup %2196  ;;  %1589 = vmatpush.msra.mxu3 %v2455_v9 }
 0xf92   : > { %2024 = vmatmul.msk.f32.gmra.mxu3 %vm132_vm0, %v2197_v41 }
0x100d   : > { %v1325_v36 = vpop.f32.mrf.mxu3 }
0x100e   : > { %v1326_v50 = vadd.f32 %v2566_v33, %v1325_v36 }
0x1010   : > { %v1339_v45 = vadd.f32 %v1337_v38, %v1326_v50 }
0x1012   : > { %v1341_v19 = vmul.f32 %v1339_v45, %v2874_v55 }
0x1014   : > { %v3060_v35 = vadd.f32 %v1341_v19, %v2970_v54 }
0x1015   : > { %v1328_v37 = vpop.f32.mrf.mxu3 }
0x1016   : > { %v1329_v59 = vadd.f32 %v2566_v33, %v1328_v37  ;;  %2025 = vmatmul.msk.f32.vlgmr.msra.gmra.mxu0 %vm132_vm0, %v3060_v35 }
0x1017   : > { %1629 = vmatpush.msra.mxu0 %v2502_v22 }
0x1018   : > { %v1340_v52 = vadd.f32 %v1338_v56, %v1329_v59 }
0x1019   : > { %1630 = vmatpush.msra.mxu0 %v2526_v26 }
0x101a   : > { %v1342_v60 = vmul.f32 %v1340_v52, %v2884_v40 }
0x101b   : > { %1631 = vmatpush.msra.mxu0 %v2538_v28 }
0x101c   : > { %v3070_v38 = vadd.f32 %v1342_v60, %v2980_v24 }
0x101d   : > { %1632 = vmatpush.msra.mxu0 %v2550_v30 }
0x101e   : > { %2026 = vmatmul.msk.f32.gmra.mxu0 %vm132_vm0, %v3070_v38 }
0x1093   : > { %v1368_v54 = vpop.f32.mrf.mxu0 }
0x1094   : > { %v1369_v51 = vadd.f32 %v2493_v15, %v1368_v54 }
0x1096   : > { %2198 = vtanh.f32 %v1369_v51 }
0x109b   : > { %v1371_v63 = vpop.f32.mrf.mxu0 }
0x109c   : > { %v2199_v56 = vpop.eup %2198  ;;  %v1372_v39 = vadd.f32 %v2493_v15, %v1371_v63 }
0x109d   : > { %2027 = vmatmul.msk.f32.vlgmr.msra.gmra.mxu1 %vm132_vm0, %v2199_v56 }
0x109e   : > { %2200 = vtanh.f32 %v1372_v39  ;;  %1661 = vmatpush.msra.mxu1 %v2467_v11 }
0x10a0   : > { %1662 = vmatpush.msra.mxu1 %v2472_v12 }
0x10a2   : > { %1663 = vmatpush.msra.mxu1 %v2485_v14 }
0x10a4   : > { %v2201_v24 = vpop.eup %2200  ;;  %1664 = vmatpush.msra.mxu1 %v2507_v23 }
0x10a5   : > { %2028 = vmatmul.msk.f32.gmra.mxu1 %vm132_vm0, %v2201_v24 }
0x111a   : > { %v1399_v44 = vpop.f32.mrf.mxu1 }
0x111b   : > { %v1400_v31 = vadd.f32 %v2566_v33, %v1399_v44 }
0x111d   : > { %v1405_v41 = vmul.f32 %v1400_v31, %v2799_v49 }
0x111f   : > { %v1407_v36 = vadd.f32 %v1405_v41, %v3060_v35 }
0x1121   : > { %2029 = vmatmul.msk.f32.vlgmr.msra.gmra.mxu2 %vm132_vm0, %v1407_v36 }
0x1122   : > { %v1402_v50 = vpop.f32.mrf.mxu1  ;;  %1684 = vmatpush.msra.mxu2 %v2480_v13 }
0x1123   : > { %v1403_v45 = vadd.f32 %v2566_v33, %v1402_v50 }
0x1124   : > { %1685 = vmatpush.msra.mxu2 %v2521_v25 }
0x1125   : > { %v1406_v19 = vmul.f32 %v1403_v45, %v2809_v58 }
0x1126   : > { %1686 = vmatpush.msra.mxu2 %v2533_v27 }
0x1127   : > { %v1408_v37 = vadd.f32 %v1406_v19, %v3070_v38 }
0x1128   : > { %1687 = vmatpush.msra.mxu2 %v2545_v29 }
0x1129   : > { %2030 = vmatmul.msk.f32.gmra.mxu2 %vm132_vm0, %v1408_v37 }
0x11a4   : > { %v1432_v59 = vpop.f32.mrf.mxu2 }
0x11a5   : > { %v1433_v52 = vadd.f32 %v2493_v15, %v1432_v59 }
0x11a7   : > { %2202 = vtanh.f32 %v1433_v52 }
0x11ac   : > { %v1435_v60 = vpop.f32.mrf.mxu2 }
0x11ad   : > { %v2203_v54 = vpop.eup %2202  ;;  %v1436_v51 = vadd.f32 %v2493_v15, %v1435_v60 }
0x11ae   : > { %2031 = vmatmul.msk.f32.vlgmr.msrb.gmra.mxu3 %vm132_vm0, %v2203_v54 }
0x11af   : > { %2204 = vtanh.f32 %v1436_v51  ;;  %2047 = vmatpush.msk.msrb.mxu3 %vm284_vm1, %v2462_v10 }
0x11b5   : > { %v2205_v63 = vpop.eup %2204 }
0x11b6   : > { %2032 = vmatmul.msk.f32.gmra.mxu3 %vm132_vm0, %v2205_v63 }
0x1231   : > { %v1463_v56 = vpop.f32.mrf.mxu3 }
0x1232   : > { %v1464_v39 = vadd.f32 %v2566_v33, %v1463_v56 }
0x1234   : > { %v1469_v24 = vmul.f32 %v1464_v39, %v2799_v49  ;;  %v1597_v54 = vmul.f32 2.0, %v1464_v39 }
0x1236   : > { %v1471_v44 = vadd.f32 %v1469_v24, %v3060_v35  ;;  %v1599_v56 = vadd.f32 %v1597_v54, %v1400_v31 }
0x1238   : > { %2033 = vmatmul.msk.f32.vlgmr.msrb.gmra.mxu0 %vm132_vm0, %v1471_v44 }
0x1239   : > { %v1466_v41 = vpop.f32.mrf.mxu3  ;;  %1796 = vmatpush.msrb.mxu0 %v2611_v4 }
0x123a   : > { %v1467_v36 = vadd.f32 %v2566_v33, %v1466_v41 }
0x123b   : > { %1797 = vmatpush.msrb.mxu0 %v2621_v16 }
0x123c   : > { %v1470_v50 = vmul.f32 %v1467_v36, %v2809_v58 }
0x123d   : > { %1798 = vmatpush.msrb.mxu0 %v2634_v20 }
0x123e   : > { %v1472_v19 = vadd.f32 %v1470_v50, %v3070_v38 }
0x123f   : > { %1799 = vmatpush.msrb.mxu0 %v2654_v42 }
0x1240   : > { %2034 = vmatmul.msk.f32.gmra.mxu0 %vm132_vm0, %v1472_v19  ;;  %v1598_v19 = vmul.f32 2.0, %v1467_v36 }
0x1242   : > { %v1600_v39 = vadd.f32 %v1598_v19, %v1403_v45 }
0x12b5   : > { %v1496_v49 = vpop.f32.mrf.mxu0 }
0x12b6   : > { %v1497_v37 = vadd.f32 %v2493_v15, %v1496_v49 }
0x12b8   : > { %2206 = vtanh.f32 %v1497_v37 }
0x12bd   : > { %v1499_v59 = vpop.f32.mrf.mxu0 }
0x12be   : > { %v2207_v52 = vpop.eup %2206  ;;  %v1500_v60 = vadd.f32 %v2493_v15, %v1499_v59 }
0x12bf   : > { %2035 = vmatmul.msk.f32.vlgmr.msrb.gmra.mxu1 %vm132_vm0, %v2207_v52 }
0x12c0   : > { %2208 = vtanh.f32 %v1500_v60  ;;  %1825 = vmatpush.msrb.mxu1 %v2616_v5 }
0x12c2   : > { %1826 = vmatpush.msrb.mxu1 %v2628_v18 }
0x12c4   : > { %1827 = vmatpush.msrb.mxu1 %v2639_v21 }
0x12c6   : > { %v2209_v58 = vpop.eup %2208  ;;  %1828 = vmatpush.msrb.mxu1 %v2659_v43 }
0x12c7   : > { %2036 = vmatmul.msk.f32.gmra.mxu1 %vm132_vm0, %v2209_v58 }
0x12cf   : > { %2043 = vmatmul.msk.f32.vlgmr.msra.gmra.mxu1 %vm132_vm0, %v2292_v53 }
0x12d7   : > { %2044 = vmatmul.msk.f32.gmra.mxu1 %vm132_vm0, %v2288_v17 }
0x133c   : > { %v1527_v51 = vpop.f32.mrf.mxu1 }
0x133d   : > { %v1528_v63 = vadd.f32 %v2566_v33, %v1527_v51 }
0x133f   : > { %v1533_v24 = vmul.f32 %v1528_v63, %v2846_v32  ;;  %v1601_v44 = vmul.f32 2.0, %v1528_v63 }
0x1341   : > { %v1535_v41 = vadd.f32 %v1533_v24, %v3060_v35  ;;  %v1603_v50 = vadd.f32 %v1601_v44, %v1599_v56 }
0x1343   : > { %2037 = vmatmul.msk.f32.vlgmr.msrb.gmra.mxu2 %vm132_vm0, %v1535_v41 }
0x1344   : > { %v1530_v49 = vpop.f32.mrf.mxu1  ;;  %2056 = vmatpush.msk.msrb.mxu2 %vm284_vm1, %v2644_v34 }
0x1345   : > { %v1531_v37 = vadd.f32 %v2566_v33, %v1530_v49 }
0x1347   : > { %v1534_v59 = vmul.f32 %v1531_v37, %v2854_v61  ;;  %v1602_v52 = vmul.f32 2.0, %v1531_v37 }
0x1349   : > { %v1536_v31 = vadd.f32 %v1534_v59, %v3070_v38  ;;  %v1604_v32 = vadd.f32 %v1602_v52, %v1600_v39 }
0x134b   : > { %2038 = vmatmul.msk.f32.gmra.mxu2 %vm132_vm0, %v1536_v31 }
0x134c   : > { %v1666_v39 = vpop.f32.mrf.mxu1 }
0x13c6   : > { %v1560_v60 = vpop.f32.mrf.mxu2 }
0x13c7   : > { %v1561_v36 = vadd.f32 %v2493_v15, %v1560_v60  ;;  %v1895_v60 = vld [vmem:[%s1893_s15 + $0x8] sm:$0xff] }
0x13c9   : > { %2210 = vtanh.f32 %v1561_v36 }
0x13ce   : > { %v1563_v58 = vpop.f32.mrf.mxu2 }
0x13cf   : > { %v2211_v54 = vpop.eup %2210  ;;  %v1564_v51 = vadd.f32 %v2493_v15, %v1563_v58 }
0x13d0   : > { %2039 = vmatmul.msk.f32.vlgmr.msra.gmra.mxu3 %vm132_vm0, %v2211_v54 }
0x13d1   : > { %2212 = vtanh.f32 %v1564_v51 }
0x13d7   : > { %v2213_v45 = vpop.eup %2212 }
0x13d8   : > { %2040 = vmatmul.msk.f32.gmra.mxu3 %vm132_vm0, %v2213_v45 }
0x13e0   : > { %2048 = vmatmul.msk.f32.vlgmr.msrb.gmra.mxu3 %vm226_vm2, %v2284_v62 }
0x13e8   : > { %2049 = vmatmul.msk.f32.gmra.mxu3 %vm226_vm2, %v2280_v47 }
0x1453   : > { %v1591_v61 = vpop.f32.mrf.mxu3 }
0x1454   : > { %v1592_v63 = vadd.f32 %v2566_v33, %v1591_v61 }
0x1456   : > { %v1605_v56 = vadd.f32 %v1603_v50, %v1592_v63 }
0x1458   : > { %v1607_v24 = vmul.f32 %v1605_v56, %v2874_v55  ;;  %v1894_v55 = vld [vmem:[%s1893_s15] sm:$0xff]  ;;  %v1669_v56 = vpop.f32.mrf.mxu1 }
0x145a   : > { %v3146_v44 = vadd.f32 %v1607_v24, %v3060_v35 }
0x145b   : > { %v1594_v41 = vpop.f32.mrf.mxu3 }
0x145c   : > { %v1595_v19 = vadd.f32 %v2566_v33, %v1594_v41  ;;  %2041 = vmatmul.msk.f32.vlgmr.msra.gmra.mxu0 %vm132_vm0, %v3146_v44  ;;  %2045 = vmatmul.msk.f32.vlgmr.msra.gmra.mxu2 %vm132_vm0, %v3146_v44 }
0x145e   : > { %v1606_v49 = vadd.f32 %v1604_v32, %v1595_v19 }
0x1460   : > { %v1608_v37 = vmul.f32 %v1606_v49, %v2884_v40  ;;  %v1896_v40 = vstv %s1890_s27 }
0x1461   : > { %v1898_v51 = vmul.f32 %v1896_v40, %v1895_v60 }
0x1462   : > { %v3155_v50 = vadd.f32 %v1608_v37, %v3070_v38  ;;  %v1897_v38 = vmul.f32 %v1896_v40, %v1894_v55 }
0x1463   : > { %v1718_v52 = vpop.f32.mrf.mxu3 }
0x1464   : > { %2042 = vmatmul.msk.f32.gmra.mxu0 %vm132_vm0, %v3155_v50  ;;  %2046 = vmatmul.msk.f32.gmra.mxu2 %vm132_vm0, %v3155_v50 }
0x146b   : > { %v1721_v19 = vpop.f32.mrf.mxu3 }
0x146c   : > { %2057 = vmatmul.msk.f32.vlgmr.msrb.gmra.mxu2 %vm226_vm2, %v2284_v62  ;;  %v1900_v62 = vstv %s1899_s8 }
0x1474   : > { %2058 = vmatmul.msk.f32.gmra.mxu2 %vm226_vm2, %v2280_v47 }
0x14d9   : > { %v1634_v35 = vpop.f32.mrf.mxu0 }
0x14da   : > { %v1635_v47 = vadd.f32 %v2597_v48, %v1634_v35 }
0x14dc   : > { %1641 = vst.msk [vmem:[%s1640_s16] sm:$0xff] %vm226_vm2, %v1635_v47  ;;  %v1901_v59 = vmul.f32 %v1900_v62, %v1635_v47 }
0x14de   : > { %v3177_v31 = vadd.f32 %v1901_v59, %v1897_v38  }
0x14df   : > { %v1689_v32 = vpop.f32.mrf.mxu2 }
0x14e0   : > { %v1690_v36 = vadd.f32 %v1689_v32, %v1666_v39 }
0x14e1   : > { %v1637_v58 = vpop.f32.mrf.mxu0 }
0x14e2   : > { %v1638_v54 = vadd.f32 %v2597_v48, %v1637_v58  ;;  %v1724_v45 = vadd.f32 %v1718_v52, %v1690_v36 }
0x14e4   : > { %1642 = vst.msk [vmem:[%s1640_s16 + $0x8] sm:$0xff] %vm226_vm2, %v1638_v54  ;;  %v1902_v61 = vmul.f32 %v1900_v62, %v1638_v54  ;;  %v1726_v63 = vadd.f32 %v2587_v46, %v1724_v45 }
0x14e6   : > { %v3182_v47 = vadd.f32 %v1902_v61, %v1898_v51   ;;  %v2050_v24 = vmul.f32 -1.442695, %v1726_v63 }
0x14e7   : > { %v1692_v41 = vpop.f32.mrf.mxu2 }
0x14e8   : > { %2214 = vpow2.f32 %v2050_v24  ;;  %v1693_v49 = vadd.f32 %v1692_v41, %v1669_v56 }
0x14ea   : > { %v1725_v37 = vadd.f32 %v1721_v19, %v1693_v49 }
0x14ec   : > { %v1727_v55 = vadd.f32 %v2587_v46, %v1725_v37 }
0x14ee   : > { %v2215_v35 = vpop.eup %2214  ;;  %v2051_v38 = vmul.f32 -1.442695, %v1727_v55 }
0x14ef   : > { %v1734_v40 = vadd.f32 1.0, %v2215_v35 }
0x14f0   : > { %2216 = vpow2.f32 %v2051_v38 }
0x14f1   : > { %2218 = vrcp.f32 %v1734_v40  ;;  %v1747_v60 = vand.u32 2147483648, %v1734_v40  ;;  %v1745_v58 = vand.u32 2147483647, %v1734_v40  ;;  %vm1741_vm12 = vweird.f32 %v1734_v40 }
0x14f3   : > { %v1748_v45 = vor.u32 1.1754944e-38, %v1747_v60  ;;  %vm1746_vm14 = vcmp.eq.f32.partialorder %v1745_v58, 8.507059e+37  ;;  %v1853_v60 = vpop.f32.mrf.mxu2 }
0x14f6   : > { %v2217_v39 = vpop.eup %2216 }
0x14f7   : > { %v2219_v62 = vpop.eup %2218  ;;  %v1735_v59 = vadd.f32 1.0, %v2217_v39 }
0x14f8   : > { %v1737_v52 = vmul.f32 %v2219_v62, %v1734_v40  ;;  %vm1742_vm11 = vweird.f32 %v2219_v62 }
0x14f9   : > { %2220 = vrcp.f32 %v1735_v59  ;;  %vm1743_vm13 = vmor %vm1741_vm12, %vm1742_vm11  ;;  %v1762_v41 = vand.u32 2147483648, %v1735_v59  ;;  %v1760_v49 = vand.u32 2147483647, %v1735_v59  ;;  %vm1756_vm3 = vweird.f32 %v1735_v59 }
0x14fa   : > { %v1738_v32 = vsub.f32 1.0, %v1737_v52 }
0x14fb   : > { %v1763_v55 = vor.u32 1.1754944e-38, %v1762_v41  ;;  %vm1761_vm5 = vcmp.eq.f32.partialorder %v1760_v49, 8.507059e+37  ;;  %v1856_v41 = vpop.f32.mrf.mxu2 }
0x14fc   : > { %v1739_v36 = vmul.f32 %v2219_v62, %v1738_v32 }
0x14fe   : > { %v1740_v54 = vadd.f32 %v2219_v62, %v1739_v36 }
0x14ff   : > { %v2221_v51 = vpop.eup %2220 }
0x1500   : > { %v1744_v61 = vsel %vm1743_vm13, %v2219_v62, %v1740_v54  ;;  %v1752_v63 = vmul.f32 %v2221_v51, %v1735_v59  ;;  %vm1757_vm15 = vweird.f32 %v2221_v51 }
0x1501   : > { %v1749_v56 = vsel %vm1746_vm14, %v1748_v45, %v1744_v61  ;;  %vm1758_vm4 = vmor %vm1756_vm3, %vm1757_vm15 }
0x1502   : > { %1768 = vrot.lane.b32.xlu0 %v1749_v56, %s2311_s17  ;;  %v1753_v24 = vsub.f32 1.0, %v1752_v63  ;;  %v1865_v61 = vsub.f32 1.0, %v1749_v56  ;;  %v1869_v63 = vmul.f32 %v1749_v56, %v3146_v44 }
0x1504   : > { %v1754_v19 = vmul.f32 %v2221_v51, %v1753_v24 }
0x1506   : > { %v1755_v37 = vadd.f32 %v2221_v51, %v1754_v19 }
0x1508   : > { %v1759_v35 = vsel %vm1758_vm4, %v2221_v51, %v1755_v37 }
0x1509   : > { %v1764_v38 = vsel %vm1761_vm5, %v1763_v55, %v1759_v35 }
0x150a   : > { %1770 = vrot.lane.b32.xlu1 %v1764_v38, %s2311_s17 }
0x1574   : > { %v1769_v40 = vpop.permute.xlu0 %1768 }
0x1575   : > { %v1774_v39 = vmul.f32 %v1769_v40, %v3146_v44  ;;  %v1776_v62 = vmul.f32 %v2292_v53, %v1769_v40 }
0x1577   : > { %2052 = vmatmul.msk.f32.vlgmr.msrb.gmra.mxu0 %vm132_vm0, %v1776_v62  ;;  %2054 = vmatmul.msk.f32.vlgmr.msrb.gmra.mxu1 %vm132_vm0, %v1774_v39  ;;  %v1866_v62 = vsub.f32 1.0, %v1764_v38 }
0x157c   : > { %v1771_v52 = vpop.permute.xlu1 %1770 }
0x157d   : > { %v1775_v32 = vmul.f32 %v1771_v52, %v3155_v50  ;;  %v1777_v59 = vmul.f32 %v2288_v17, %v1771_v52  ;;  %v1870_v52 = vmul.f32 %v1764_v38, %v3155_v50 }
0x157f   : > { %2053 = vmatmul.msk.f32.gmra.mxu0 %vm132_vm0, %v1777_v59  ;;  %2055 = vmatmul.msk.f32.gmra.mxu1 %vm132_vm0, %v1775_v32 }
0x15f4   : > { %v1801_v36 = vpop.f32.mrf.mxu0  ;;  %v1830_v58 = vpop.f32.mrf.mxu1 }
0x15f5   : > { %v1831_v54 = vadd.f32 %v1830_v58, %v1801_v36  ;;  %v1883_v36 = vmul.f32 %v2292_v53, %v1749_v56 }
0x15f7   : > { %v1859_v51 = vadd.f32 %v1853_v60, %v1831_v54 }
0x15f9   : > { %v1861_v45 = vadd.f32 %v2686_v57, %v1859_v51  ;;  %v1884_v51 = vmul.f32 %v2288_v17, %v1764_v38 }
0x15fb   : > { %v1863_v24 = vand.u32 2147483647, %v1861_v45  ;;  %v1867_v19 = vmul.f32 %v1865_v61, %v1861_v45 }
0x15fc   : > { %v1804_v49 = vpop.f32.mrf.mxu0  ;;  %v1833_v37 = vpop.f32.mrf.mxu1 }
0x15fd   : > { %v1834_v55 = vadd.f32 %v1833_v37, %v1804_v49  ;;  %1875 = vrot.lane.b32.xlu2 %v1863_v24, %s2311_s17  ;;  %v1871_v39 = vadd.f32 %v1869_v63, %v1867_v19  }
0x15ff   : > { %v1860_v35 = vadd.f32 %v1856_v41, %v1834_v55 }
0x1601   : > { %v1862_v40 = vadd.f32 %v2686_v57, %v1860_v35 }
0x1603   : > { %v1864_v32 = vand.u32 2147483647, %v1862_v40  ;;  %v1868_v59 = vmul.f32 %v1866_v62, %v1862_v40 }
0x1605   : > { %1877 = vrot.lane.b32.xlu0 %v1864_v32, %s2311_s17  ;;  %v1872_v37 = vadd.f32 %v1870_v52, %v1868_v59  }
0x1657   : > { %v1876_v44 = vpop.permute.xlu2 %1875 }
0x1658   : > { %v1881_v60 = vmul.f32 %v1876_v44, %v1865_v61 }
0x165a   : > { %v1885_v53 = vadd.f32 %v1883_v36, %v1881_v60  }
0x1676   :  { %499 = sbr.rel (!%p497_p2) target bundleno = 829 (0x33d), region = 101 }
0x1677   : > { %v1878_v58 = vpop.permute.xlu0 %1877 }
0x1678   : > { %v1882_v54 = vmul.f32 %v1878_v58, %v1866_v62  ;;  %v3235_v62 = vmov %v3177_v31 }
0x167a   : > { %v1886_v17 = vadd.f32 %v1884_v51, %v1882_v54  }
0x167b   :  { %1909 = vsyncpa [#allocation3], 1 }
0x167c   :  { %1910 = vsyncpa [#allocation5], 1 }

</bundles_post_ra>
